<compile_context>
chip_gen: v7x
topology: tpu7x:2x2x1
jax: 0.10.0
libtpu: 0.0.40
codegen_flags: <defaults>
</compile_context>

<pallas_src>
import functools

import jax
import jax.numpy as jnp
from jax.experimental import pallas as pl
from jax.experimental.pallas import tpu as pltpu


def _round_up(x, m):
    return (x + m - 1) // m * m


def atom_encoder_kernel(x_ref, table_ref, out_ref, *, offsets):
    """One N-tile: out[n, :] = sum_i table[x[n, i] + offset_i, :]."""
    x = x_ref[...]                                        # [tn, F] int32
    tn = x.shape[0]
    v_pad = table_ref.shape[0]

    # One full-width iota reused for every feature: whole-vreg VALU compares,
    # masks OR'd (feature slabs are disjoint), single cast at the end.  The
    # tail lanes (iota >= V) never match any x + offset, so they stay zero.
    iota = jax.lax.broadcasted_iota(jnp.int32, (tn, v_pad), 1)
    mask = iota == (x[:, 0:1] + offsets[0])
    for i in range(1, len(offsets)):                      # F is small & static
        mask = jnp.logical_or(mask, iota == (x[:, i:i + 1] + offsets[i]))
    onehot = mask.astype(jnp.float32)                     # [tn, V_pad] multi-hot

    # Single MXU matmul does all F gathers + the feature sum.  Pin precision
    # so the f32 path is exact (no implicit bf16 passes).
    out_ref[...] = jnp.dot(onehot, table_ref[...],
                           preferred_element_type=jnp.float32,
                           precision=jax.lax.Precision.HIGHEST)


def atom_encoder(x, tables, *, tile_n=None):
    """x: [N, F] int32, tables: list of [dim_i, E] float32 -> [N, E] float32."""
    dims = tuple(int(t.shape[0]) for t in tables)
    offsets = tuple(sum(dims[:i]) for i in range(len(dims)))
    e = int(tables[0].shape[1])
    v = sum(dims)
    v_pad = _round_up(v, 128)
    e_pad = _round_up(e, 128)

    # Concatenated, zero-padded table [V_pad, E_pad] (padded rows/cols are 0).
    table = jnp.concatenate(tables, axis=0)
    table = jnp.pad(table, ((0, v_pad - v), (0, e_pad - e)))

    n, f = x.shape
    if tile_n is None:
        # Small N: one grid step, minimal padding.  Large N: 512-row tiles to
        # amortize per-step overhead and fill the MXU M dimension (and give
        # v7x's 2 TCs multiple parallel steps each).
        tile_n = _round_up(n, 8) if n <= 512 else 512
    n_pad = _round_up(n, tile_n)
    x_p = jnp.pad(x, ((0, n_pad - n), (0, 0)))            # pad rows hit index 0

    kernel = functools.partial(atom_encoder_kernel, offsets=offsets)
    out = pl.pallas_call(
        kernel,
        out_shape=jax.ShapeDtypeStruct((n_pad, e_pad), jnp.float32),
        grid=(n_pad // tile_n,),
        in_specs=[
            pl.BlockSpec((tile_n, f), lambda i: (i, 0)),       # x tile
            pl.BlockSpec((v_pad, e_pad), lambda i: (0, 0)),    # full concat table
        ],
        out_specs=pl.BlockSpec((tile_n, e_pad), lambda i: (i, 0)),
        compiler_params=pltpu.CompilerParams(
            dimension_semantics=("parallel",)),
    )(x_p, table)
    return out[:n, :e]


def xavier_uniform(key, shape):
    fan_in, fan_out = shape
    bound = (6.0 / (fan_in + fan_out)) ** 0.5
    return jax.random.uniform(key, shape, jnp.float32, -bound, bound)


if __name__ == "__main__":
    emb_dim = 32
    full_atom_feature_dims = [5, 7, 9]
    num_nodes = 300                                       # not a multiple of 8

    key = jax.random.PRNGKey(0)
    keys = jax.random.split(key, len(full_atom_feature_dims) + 1)

    # Deterministic xavier_uniform-initialized embedding tables (as in __init__).
    tables = [xavier_uniform(keys[i], (d, emb_dim))
              for i, d in enumerate(full_atom_feature_dims)]

    # Deterministic integer atom features, each column within its own vocab.
    x_cols = [
        jax.random.randint(jax.random.fold_in(keys[-1], i),
                           (num_nodes, 1), 0, d, dtype=jnp.int32)
        for i, d in enumerate(full_atom_feature_dims)
    ]
    x = jnp.concatenate(x_cols, axis=1)                   # [N, F] int32

    out = atom_encoder(x, tables)
    out = jax.block_until_ready(out)

    # Pure-JAX reference of the torch forward (sum of per-column lookups).
    ref = sum(tables[i][x[:, i]] for i in range(len(tables)))
    assert out.shape == (num_nodes, emb_dim)
    assert jnp.allclose(out, ref, atol=1e-5), "mismatch vs reference"

    print("KERNEL_OK")
</pallas_src>

<mosaic_0001>
module attributes {stable_mosaic.version = 11 : i64} {
  func.func @atom_encoder_kernel(%arg0: i32, %arg1: memref<304x3xi32, #tpu.memory_space<vmem>>, %arg2: memref<128x128xf32, #tpu.memory_space<vmem>>, %arg3: memref<304x128xf32, #tpu.memory_space<vmem>>) attributes {dimension_semantics = [#tpu.dimension_semantics<parallel>], iteration_bounds = array<i64: 1>, scalar_prefetch = 0 : i64, scratch_operands = 0 : i64, tpu.core_type = #tpu.core_type<tc>, window_params = [{transform_indices = @transform_0, window_bounds = array<i64: 304, 3>}, {pipeline_mode = #tpu.pipeline_mode<synchronous>, transform_indices = @transform_1, window_bounds = array<i64: 128, 128>}, {transform_indices = @transform_2, window_bounds = array<i64: 304, 128>}]} {
    %c0 = arith.constant 0 : index
    %c0_0 = arith.constant 0 : index
    %0 = vector.load %arg1[%c0, %c0_0] : memref<304x3xi32, #tpu.memory_space<vmem>>, vector<304x3xi32>
    %1 = tpu.iota {dimensions = array<i32: 1>} : vector<304x128xi32>
    %2 = vector.extract_strided_slice %0 {offsets = [0, 0], sizes = [304, 1], strides = [1, 1]} : vector<304x3xi32> to vector<304x1xi32>
    %c0_i32 = arith.constant 0 : i32
    %3 = vector.broadcast %c0_i32 : i32 to vector<304x1xi32>
    %4 = arith.addi %2, %3 : vector<304x1xi32>
    %5 = vector.broadcast %4 : vector<304x1xi32> to vector<304x128xi32>
    %6 = arith.cmpi eq, %1, %5 : vector<304x128xi32>
    %7 = vector.extract_strided_slice %0 {offsets = [0, 1], sizes = [304, 1], strides = [1, 1]} : vector<304x3xi32> to vector<304x1xi32>
    %c5_i32 = arith.constant 5 : i32
    %8 = vector.broadcast %c5_i32 : i32 to vector<304x1xi32>
    %9 = arith.addi %7, %8 : vector<304x1xi32>
    %10 = vector.broadcast %9 : vector<304x1xi32> to vector<304x128xi32>
    %11 = arith.cmpi eq, %1, %10 : vector<304x128xi32>
    %12 = arith.ori %6, %11 : vector<304x128xi1>
    %13 = vector.extract_strided_slice %0 {offsets = [0, 2], sizes = [304, 1], strides = [1, 1]} : vector<304x3xi32> to vector<304x1xi32>
    %c12_i32 = arith.constant 12 : i32
    %14 = vector.broadcast %c12_i32 : i32 to vector<304x1xi32>
    %15 = arith.addi %13, %14 : vector<304x1xi32>
    %16 = vector.broadcast %15 : vector<304x1xi32> to vector<304x128xi32>
    %17 = arith.cmpi eq, %1, %16 : vector<304x128xi32>
    %18 = arith.ori %12, %17 : vector<304x128xi1>
    %19 = arith.extui %18 : vector<304x128xi1> to vector<304x128xi32>
    %20 = arith.sitofp %19 : vector<304x128xi32> to vector<304x128xf32>
    %c0_1 = arith.constant 0 : index
    %c0_2 = arith.constant 0 : index
    %21 = vector.load %arg2[%c0_1, %c0_2] : memref<128x128xf32, #tpu.memory_space<vmem>>, vector<128x128xf32>
    %cst = arith.constant dense<0.000000e+00> : vector<304x128xf32>
    %22 = tpu.matmul %20, %21, %cst {dimension_numbers = #tpu.dot_dimension_numbers<[1], [0], [0], [1], [0, 0, 1, 1], [], []>, precision = #tpu.contract_precision<fp32>} : vector<304x128xf32>, vector<128x128xf32>, vector<304x128xf32> -> vector<304x128xf32>
    %c0_3 = arith.constant 0 : index
    %c0_4 = arith.constant 0 : index
    %23 = vector.load %arg3[%c0_3, %c0_4] : memref<304x128xf32, #tpu.memory_space<vmem>>, vector<304x128xf32>
    tpu.vector_store %arg3[%c0_3, %c0_4], %22 {strides = array<i32>} : memref<304x128xf32, #tpu.memory_space<vmem>>, vector<304x128xf32>,
    return
  }
  func.func @transform_0(%arg0: i32) -> (i32, i32) {
    %c0_i32 = arith.constant 0 : i32
    %c0_i32_0 = arith.constant 0 : i32
    return %arg0, %c0_i32 : i32, i32
  }
  func.func @transform_1(%arg0: i32) -> (i32, i32) {
    %c0_i32 = arith.constant 0 : i32
    %c0_i32_0 = arith.constant 0 : i32
    %c0_i32_1 = arith.constant 0 : i32
    return %c0_i32, %c0_i32_0 : i32, i32
  }
  func.func @transform_2(%arg0: i32) -> (i32, i32) {
    %c0_i32 = arith.constant 0 : i32
    %c0_i32_0 = arith.constant 0 : i32
    return %arg0, %c0_i32 : i32, i32
  }
}

</mosaic_0001>

<bundles_post_ra>
// kernel: tpu_custom_call.1
= control target key start
LH: loop header
LB: loop body
LE: loop exit
PB: predicated region body
PF: predicated region fallthrough
CT: control target
= control target key end

     0   :  { %v6272_v2 = vmov 0   ;;  %v6261_v3 = vmov 1   ;;  %s6240_s0 = inlined_call_operand.vmem [shape: s32[304,3], index: 0, kind: input, shape index: {}]   ;;  %s6241_s1 = inlined_call_operand.vmem [shape: f32[128,128], index: 1, kind: input, shape index: {}]   ;;  %s6242_s2 = inlined_call_operand.hbm [shape: f32[304,128], index: 2, kind: output, shape index: {}]  }
   0x1   :  { %v4567_v0 = vld [vmem:[%s6240_s0 + $0x8] sm:$0xff]  ;;  %v12_v1 = vld [vmem:[%s6240_s0] sm:$0xff]  ;;  %4440 = vset.pattern.permute.xlu1 %v6272_v2  ;;  %4438 = vset.pattern.permute.xlu0 %v6261_v3  ;;  %v4581_v7 = vld [vmem:[%s6240_s0 + $0x18] sm:$0xff] }
   0x2   :  { %v204_v4 = vadd.s32 5, %v12_v1  ;;  %56 = vperm.xlu1 %4440, %v4567_v0   ;;  %v205_v5 = vadd.s32 5, %v4567_v0  ;;  %v432_v6 = vadd.s32 12, %v12_v1 }
   0x4   :  { %243 = vperm.xlu0 %4438, %v204_v4  }
   0x6   :  { %4441 = vset.pattern.permute.xlu1 %v6261_v3 }
   0x7   :  { %246 = vperm.xlu1 %4441, %v205_v5  }
   0x8   :  { %4439 = vset.pattern.permute.xlu0 %v6272_v2 }
   0x9   :  { %53 = vperm.xlu0 %4439, %v12_v1  }
   0xa   :  { %7 = vsyncpa [#allocation3], 0  ;;  %v6264_v8 = vmov 2   ;;  %v4588_v9 = vld [vmem:[%s6240_s0 + $0x28] sm:$0xff]  ;;  %v14_v10 = vld [vmem:[%s6240_s0 + $0x10] sm:$0xff]  ;;  %v207_v14 = vadd.s32 5, %v4581_v7 }
   0xb   :  { %4442 = vset.pattern.permute.xlu1 %v6264_v8  ;;  %v4598_v11 = vld [vmem:[%s6240_s0 + $0x38] sm:$0xff]  ;;  %v206_v12 = vadd.s32 5, %v14_v10  ;;  %v4605_v13 = vld [vmem:[%s6240_s0 + $0x48] sm:$0xff]  ;;  %v434_v16 = vadd.s32 12, %v14_v10  ;;  %v16_v18 = vld [vmem:[%s6240_s0 + $0x20] sm:$0xff]  ;;  %v209_v23 = vadd.s32 5, %v4588_v9 }
   0xc   :  { %471 = vperm.xlu1 %4442, %v432_v6   ;;  %v4612_v15 = vld [vmem:[%s6240_s0 + $0x58] sm:$0xff]  ;;  %v4618_v17 = vld [vmem:[%s6240_s0 + $0x68] sm:$0xff]  ;;  %v208_v21 = vadd.s32 5, %v16_v18  ;;  %v436_v25 = vadd.s32 12, %v16_v18  ;;  %v18_v27 = vld [vmem:[%s6240_s0 + $0x30] sm:$0xff]  ;;  %v211_v38 = vadd.s32 5, %v4598_v11 }
   0xd   :  { %62 = vperm.xlu0 %4439, %v4581_v7   ;;  %v4628_v19 = vld [vmem:[%s6240_s0 + $0x78] sm:$0xff]  ;;  %v4635_v20 = vld [vmem:[%s6240_s0 + $0x88] sm:$0xff]  ;;  %v4671_v29 = vld [vmem:[%s6241_s1] sm:$0xff]  ;;  %v210_v31 = vadd.s32 5, %v18_v27  ;;  %v438_v48 = vadd.s32 12, %v18_v27 }
   0xe   :  { %v4642_v22 = vld [vmem:[%s6240_s0 + $0x98] sm:$0xff]  ;;  %v4649_v24 = vld [vmem:[%s6240_s0 + $0xa8] sm:$0xff]  ;;  %v6258_v32 = vand.u32 4294901760, %v4671_v29  ;;  %v4696_v36 = vld [vmem:[%s6241_s1 + $0x10] sm:$0xff] }
   0xf   :  { %v4656_v26 = vld [vmem:[%s6240_s0 + $0xb8] sm:$0xff]  ;;  %v4665_v28 = vld [vmem:[%s6240_s0 + $0xc8] sm:$0xff]  ;;  %v6256_v39 = vand.u32 4294901760, %v4696_v36  ;;  %v4725_v43 = vld [vmem:[%s6241_s1 + $0x20] sm:$0xff] }
  0x10   :  { %4443 = vset.pattern.permute.xlu1 %v6272_v2  ;;  %v4676_v30 = vld [vmem:[%s6241_s1 + $0x8] sm:$0xff]  ;;  %v4684_v34 = vld [vmem:[%s6240_s0 + $0xd8] sm:$0xff]  ;;  %v6254_v45 = vand.u32 4294901760, %v4725_v43  ;;  %v4753_v50 = vld [vmem:[%s6241_s1 + $0x30] sm:$0xff] }
  0x11   :  { %68 = vperm.xlu0 %4439, %v4588_v9   ;;  %59 = vperm.xlu1 %4443, %v14_v10   ;;  %v6257_v33 = vand.u32 4294901760, %v4676_v30  ;;  %v4701_v37 = vld [vmem:[%s6241_s1 + $0x18] sm:$0xff]  ;;  %v4710_v41 = vld [vmem:[%s6240_s0 + $0xe8] sm:$0xff]  ;;  %v6252_v52 = vand.u32 4294901760, %v4753_v50  ;;  %v20_v56 = vld [vmem:[%s6240_s0 + $0x40] sm:$0xff] }
  0x12   :  { %v6255_v40 = vand.u32 4294901760, %v4701_v37  ;;  %v4730_v44 = vld [vmem:[%s6241_s1 + $0x28] sm:$0xff]  ;;  %v4738_v47 = vld [vmem:[%s6240_s0 + $0xf8] sm:$0xff]  ;;  %v4785_v57 = vld [vmem:[%s6241_s1 + $0x40] sm:$0xff]  ;;  %v212_v63 = vadd.s32 5, %v20_v56 }
  0x13   :  { %v4690_v35 = vpack.c.bf16 %v6257_v33, %v6258_v32  ;;  %v6253_v46 = vand.u32 4294901760, %v4730_v44  ;;  %v4758_v51 = vld [vmem:[%s6241_s1 + $0x38] sm:$0xff]  ;;  %v4767_v54 = vld [vmem:[%s6240_s0 + $0x108] sm:$0xff]  ;;  %v6250_v59 = vand.u32 4294901760, %v4785_v57  ;;  %v4814_v1 = vld [vmem:[%s6241_s1 + $0x50] sm:$0xff] }
  0x14   :  { %v4719_v42 = vpack.c.bf16 %v6255_v40, %v6256_v39  ;;  %v6251_v53 = vand.u32 4294901760, %v4758_v51  ;;  %v4790_v58 = vld [vmem:[%s6241_s1 + $0x48] sm:$0xff]  ;;  %v4800_v61 = vld [vmem:[%s6240_s0 + $0x118] sm:$0xff]  ;;  %v6248_v5 = vand.u32 4294901760, %v4814_v1 }
  0x15   :  { %74 = vperm.xlu0 %4439, %v4598_v11   ;;  %4444 = vset.pattern.permute.xlu1 %v6261_v3  ;;  %v4747_v49 = vpack.c.bf16 %v6253_v46, %v6254_v45  ;;  %v6249_v60 = vand.u32 4294901760, %v4790_v58  ;;  %v4819_v4 = vld [vmem:[%s6241_s1 + $0x58] sm:$0xff]  ;;  %v4828_v10 = vld [vmem:[%s6240_s0 + $0x128] sm:$0xff] }
  0x16   :  { %249 = vperm.xlu1 %4444, %v206_v12   ;;  %4145 = vmatprep.subr.bf16.mxu0 %v4690_v35  ;;  %6408 = vst [vmem:[#allocation5_spill] sm:$0xff] %v4719_v42  ;;  %v4776_v55 = vpack.c.bf16 %v6251_v53, %v6252_v52  ;;  %v6247_v6 = vand.u32 4294901760, %v4819_v4 }
  0x17   :  { %4049 = vmatprep.subr.bf16.mxu1 %v4690_v35  ;;  %4147 = vmatpush3.bf16.msra.mxu0 %v4690_v35  ;;  %6409 = vst [vmem:[#allocation6_spill] sm:$0xff] %v4747_v49  ;;  %v4808_v62 = vpack.c.bf16 %v6249_v60, %v6250_v59 }
  0x18   :  { %4051 = vmatpush3.bf16.msra.mxu1 %v4690_v35  ;;  %4149 = vmatprep.subr.bf16.mxu0 %v4719_v42  ;;  %6410 = vst [vmem:[#allocation7_spill] sm:$0xff] %v4776_v55  ;;  %v4837_v12 = vpack.c.bf16 %v6247_v6, %v6248_v5  ;;  %v28_v5 = vld [vmem:[%s6240_s0 + $0x80] sm:$0xff] }
  0x19   :  { %80 = vperm.xlu0 %4439, %v4605_v13   ;;  %4053 = vmatprep.subr.bf16.mxu1 %v4719_v42  ;;  %6411 = vst [vmem:[#allocation8_spill] sm:$0xff] %v4808_v62 }
  0x1a   :  { %252 = vperm.xlu1 %4444, %v207_v14   ;;  %6412 = vst [vmem:[#allocation9_spill] sm:$0xff] %v4837_v12  ;;  %v213_v14 = vadd.s32 5, %v4605_v13 }
  0x1b   :  { %4151 = vmatpush3.bf16.msra.mxu0 %v4719_v42 }
  0x1c   :  { %4055 = vmatpush3.bf16.msra.mxu1 %v4719_v42  ;;  %4153 = vmatprep.subr.bf16.mxu0 %v4747_v49 }
  0x1d   :  { %86 = vperm.xlu0 %4439, %v4612_v15   ;;  %4057 = vmatprep.subr.bf16.mxu1 %v4747_v49 }
  0x1e   :  { %4445 = vset.pattern.permute.xlu1 %v6264_v8 }
  0x1f   :  { %477 = vperm.xlu1 %4445, %v434_v16   ;;  %4155 = vmatpush3.bf16.msra.mxu0 %v4747_v49  ;;  %v4844_v16 = vld [vmem:[%s6241_s1 + $0x60] sm:$0xff] }
  0x20   :  { %4059 = vmatpush3.bf16.msra.mxu1 %v4747_v49  ;;  %4157 = vmatprep.subr.bf16.mxu0 %v4776_v55 }
  0x21   :  { %92 = vperm.xlu0 %4439, %v4618_v17   ;;  %4061 = vmatprep.subr.bf16.mxu1 %v4776_v55 }
  0x23   :  { %4446 = vset.pattern.permute.xlu1 %v6272_v2  ;;  %4159 = vmatpush3.bf16.msra.mxu0 %v4776_v55 }
  0x24   :  { %65 = vperm.xlu1 %4446, %v16_v18   ;;  %4063 = vmatpush3.bf16.msra.mxu1 %v4776_v55  ;;  %v4849_v18 = vld [vmem:[%s6241_s1 + $0x68] sm:$0xff] }
  0x25   :  { %98 = vperm.xlu0 %4439, %v4628_v19   ;;  %4161 = vmatprep.subr.bf16.mxu0 %v4808_v62 }
  0x26   :  { %4065 = vmatprep.subr.bf16.mxu1 %v4808_v62 }
  0x27   :  { %4163 = vmatpush3.bf16.msra.mxu0 %v4808_v62 }
  0x28   :  { %4447 = vset.pattern.permute.xlu1 %v6261_v3  ;;  %4067 = vmatpush3.bf16.msra.mxu1 %v4808_v62  ;;  %v6419_v62 = vmov 2  }
  0x29   :  { %104 = vperm.xlu0 %4439, %v4635_v20   ;;  %255 = vperm.xlu1 %4447, %v208_v21   ;;  %v6246_v21 = vand.u32 4294901760, %v4844_v16 }
  0x2a   :  { %4165 = vmatprep.subr.bf16.mxu0 %v4837_v12  ;;  %4069 = vmatprep.subr.bf16.mxu1 %v4837_v12 }
  0x2b   :  { %4167 = vmatpush3.bf16.msra.mxu0 %v4837_v12 }
  0x2c   :  { %4071 = vmatpush3.bf16.msra.mxu1 %v4837_v12 }
  0x2d   :  { %110 = vperm.xlu0 %4439, %v4642_v22   ;;  %258 = vperm.xlu1 %4447, %v209_v23   ;;  %v6243_v23 = vand.u32 4294901760, %v4849_v18 }
  0x31   :  { %116 = vperm.xlu0 %4439, %v4649_v24   ;;  %4448 = vset.pattern.permute.xlu1 %v6264_v8 }
  0x32   :  { %483 = vperm.xlu1 %4448, %v436_v25   ;;  %v433_v25 = vadd.s32 12, %v4567_v0  ;;  %v4873_v0 = vld [vmem:[%s6241_s1 + $0x78] sm:$0xff] }
  0x35   :  { %122 = vperm.xlu0 %4439, %v4656_v26  }
  0x36   :  { %4449 = vset.pattern.permute.xlu1 %v6272_v2 }
  0x37   :  { %71 = vperm.xlu1 %4449, %v18_v27   ;;  %v4862_v27 = vpack.c.bf16 %v6243_v23, %v6246_v21  ;;  %v445_v21 = vadd.s32 12, %v4618_v17 }
  0x39   :  { %128 = vperm.xlu0 %4439, %v4665_v28   ;;  %6413 = vst [vmem:[#allocation10_spill] sm:$0xff] %v4862_v27  ;;  %4169 = vmatprep.subr.bf16.mxu0 %v4862_v27 }
  0x3a   :  { %4073 = vmatprep.subr.bf16.mxu1 %v4862_v27  ;;  %4171 = vmatpush3.bf16.msra.mxu0 %v4862_v27 }
  0x3b   :  { %4450 = vset.pattern.permute.xlu1 %v6261_v3  ;;  %4075 = vmatpush3.bf16.msra.mxu1 %v4862_v27 }
  0x3c   :  { %261 = vperm.xlu1 %4450, %v210_v31   ;;  %v4868_v31 = vld [vmem:[%s6241_s1 + $0x70] sm:$0xff] }
  0x3d   :  { %134 = vperm.xlu0 %4439, %v4684_v34  }
  0x40   :  { %264 = vperm.xlu1 %4450, %v211_v38   ;;  %v440_v38 = vadd.s32 12, %v20_v56 }
  0x41   :  { %140 = vperm.xlu0 %4439, %v4710_v41  }
  0x44   :  { %4451 = vset.pattern.permute.xlu1 %v6264_v8 }
  0x45   :  { %146 = vperm.xlu0 %4439, %v4738_v47   ;;  %489 = vperm.xlu1 %4451, %v438_v48   ;;  %v6245_v48 = vand.u32 4294901760, %v4868_v31 }
  0x49   :  { %152 = vperm.xlu0 %4439, %v4767_v54   ;;  %4452 = vset.pattern.permute.xlu1 %v6272_v2 }
  0x4a   :  { %77 = vperm.xlu1 %4452, %v20_v56   ;;  %v22_v56 = vld [vmem:[%s6240_s0 + $0x50] sm:$0xff] }
  0x4d   :  { %158 = vperm.xlu0 %4439, %v4800_v61  }
  0x4e   :  { %4453 = vset.pattern.permute.xlu1 %v6261_v3 }
  0x4f   :  { %267 = vperm.xlu1 %4453, %v212_v63   ;;  %v6244_v63 = vand.u32 4294901760, %v4873_v0 }
  0x51   :  { %164 = vperm.xlu0 %4439, %v4828_v10   ;;  %v4886_v23 = vpack.c.bf16 %v6244_v63, %v6245_v48  ;;  %v443_v63 = vadd.s32 12, %v4612_v15  ;;  %v442_v48 = vadd.s32 12, %v22_v56 }
  0x53   :  { %270 = vperm.xlu1 %4453, %v213_v14   ;;  %v435_v14 = vadd.s32 12, %v4581_v7  ;;  %6414 = vst [vmem:[#allocation11_spill] sm:$0xff] %v4886_v23  ;;  %4173 = vmatprep.subr.bf16.mxu0 %v4886_v23  ;;  %v437_v7 = vadd.s32 12, %v4588_v9  ;;  %v441_v9 = vadd.s32 12, %v4605_v13  ;;  %v447_v13 = vadd.s32 12, %v4628_v19 }
  0x54   :  { %4077 = vmatprep.subr.bf16.mxu1 %v4886_v23  ;;  %4175 = vmatpush3.bf16.msra.mxu0 %v4886_v23 }
  0x55   :  { %4496 = vset.pattern.permute.xlu0 %v6264_v8  ;;  %4079 = vmatpush3.bf16.msra.mxu1 %v4886_v23 }
  0x56   :  { %474 = vperm.xlu0 %4496, %v433_v25   ;;  %v439_v25 = vadd.s32 12, %v4598_v11  ;;  %v24_v11 = vld [vmem:[%s6240_s0 + $0x60] sm:$0xff] }
  0x57   :  { %4454 = vset.pattern.permute.xlu1 %v6264_v8 }
  0x58   :  { %495 = vperm.xlu1 %4454, %v440_v38   ;;  %v214_v38 = vadd.s32 5, %v22_v56 }
  0x5a   :  { %480 = vperm.xlu0 %4496, %v435_v14   ;;  %v215_v14 = vadd.s32 5, %v4612_v15  ;;  %v449_v15 = vadd.s32 12, %v4635_v20 }
  0x5c   :  { %4455 = vset.pattern.permute.xlu1 %v6272_v2 }
  0x5d   :  { %83 = vperm.xlu1 %4455, %v22_v56   ;;  %v444_v56 = vadd.s32 12, %v24_v11 }
  0x5e   :  { %486 = vperm.xlu0 %4496, %v437_v7   ;;  %v216_v7 = vadd.s32 5, %v24_v11 }
  0x61   :  { %4456 = vset.pattern.permute.xlu1 %v6261_v3 }
  0x62   :  { %492 = vperm.xlu0 %4496, %v439_v25   ;;  %273 = vperm.xlu1 %4456, %v214_v38   ;;  %v455_v25 = vadd.s32 12, %v4656_v26  ;;  %v26_v38 = vld [vmem:[%s6240_s0 + $0x70] sm:$0xff] }
  0x66   :  { %498 = vperm.xlu0 %4496, %v441_v9   ;;  %276 = vperm.xlu1 %4456, %v215_v14   ;;  %v50_v9 = vlaneseq  ;;  %v457_v14 = vadd.s32 12, %v4665_v28 }
  0x6a   :  { %504 = vperm.xlu0 %4496, %v443_v63   ;;  %4457 = vset.pattern.permute.xlu1 %v6264_v8  ;;  %v217_v63 = vadd.s32 5, %v4618_v17 }
  0x6b   :  { %501 = vperm.xlu1 %4457, %v442_v48   ;;  %v451_v48 = vadd.s32 12, %v4642_v22 }
  0x6e   :  { %510 = vperm.xlu0 %4496, %v445_v21   ;;  %v453_v21 = vadd.s32 12, %v4649_v24 }
  0x6f   :  { %4458 = vset.pattern.permute.xlu1 %v6272_v2 }
  0x70   :  { %89 = vperm.xlu1 %4458, %v24_v11   ;;  %v218_v11 = vadd.s32 5, %v26_v38 }
  0x72   :  { %516 = vperm.xlu0 %4496, %v447_v13  }
  0x74   :  { %4459 = vset.pattern.permute.xlu1 %v6261_v3 }
  0x75   :  { %279 = vperm.xlu1 %4459, %v216_v7   ;;  %v4925_v7 = vand.u32 127, %v50_v9 }
  0x76   :  { %522 = vperm.xlu0 %4496, %v449_v15   ;;  %v459_v15 = vadd.s32 12, %v4684_v34 }
  0x79   :  { %282 = vperm.xlu1 %4459, %v217_v63  }
  0x7a   :  { %528 = vperm.xlu0 %4496, %v451_v48  }
  0x7d   :  { %4460 = vset.pattern.permute.xlu1 %v6264_v8 }
  0x7e   :  { %534 = vperm.xlu0 %4496, %v453_v21   ;;  %507 = vperm.xlu1 %4460, %v444_v56   ;;  %v219_v21 = vadd.s32 5, %v4628_v19  ;;  %v461_v56 = vadd.s32 12, %v4710_v41 }
  0x81   :  { %v4921_v17 = vpop.permute.xlu1 %56 }
  0x82   :  { %540 = vperm.xlu0 %4496, %v455_v25   ;;  %4461 = vset.pattern.permute.xlu1 %v6272_v2 }
  0x83   :  { %v244_v13 = vpop.permute.xlu0 %243  ;;  %95 = vperm.xlu1 %4461, %v26_v38  }
  0x84   :  { %vm356_vm0 = vcmp.eq.s32.totalorder %v4925_v7, %v244_v13  ;;  %v446_v13 = vadd.s32 12, %v26_v38  ;;  %v465_v38 = vadd.s32 12, %v4767_v54 }
  0x86   :  { %546 = vperm.xlu0 %4496, %v457_v14   ;;  %v4928_v63 = vpop.permute.xlu1 %246 }
  0x87   :  { %4462 = vset.pattern.permute.xlu1 %v6261_v3  ;;  %vm357_vm13 = vcmp.eq.s32.totalorder %v4925_v7, %v4928_v63  ;;  %v227_v63 = vadd.s32 5, %v4656_v26 }
  0x88   :  { %v54_v48 = vpop.permute.xlu0 %53  ;;  %285 = vperm.xlu1 %4462, %v218_v11   ;;  %v6259_v11 = vmov 0.0  }
  0x89   :  { %vm166_vm1 = vcmp.eq.s32.totalorder %v4925_v7, %v54_v48 }
  0x8a   :  { %552 = vperm.xlu0 %4496, %v459_v15   ;;  %vm394_vm2 = vmor %vm166_vm1, %vm356_vm0  ;;  %v463_v15 = vadd.s32 12, %v4738_v47  ;;  %vm167_vm1 = vcmp.eq.s32.totalorder %v4925_v7, %v4921_v17 }
  0x8b   :  { %v472_v25 = vpop.permute.xlu1 %471 }
  0x8c   :  { %v4935_v9 = vpop.permute.xlu0 %62  ;;  %vm584_vm3 = vcmp.eq.s32.totalorder %v4925_v7, %v472_v25  ;;  %288 = vperm.xlu1 %4462, %v219_v21  }
  0x8d   :  { %vm4938_vm4 = vmor %vm394_vm2, %vm584_vm3 }
  0x8e   :  { %558 = vperm.xlu0 %4496, %v461_v56   ;;  %v3038_v19 = vsel %vm4938_vm4, 1.0, %v6259_v11 }
  0x8f   :  { %v4948_v6 = vsub.f32 %v3038_v19, %v3038_v19 }
  0x90   :  { %v4946_v48 = vpop.permute.xlu0 %68  ;;  %4463 = vset.pattern.permute.xlu1 %v6264_v8  ;;  %v4951_v21 = vpop.permute.xlu1 %59 }
  0x91   :  { %6417 = vst [vmem:[#allocation12_spill] sm:$0xff] %v4948_v6  ;;  %513 = vperm.xlu1 %4463, %v446_v13   ;;  %v835_v25 = vand.u32 4294901760, %v4948_v6  ;;  %v467_v13 = vadd.s32 12, %v4800_v61  ;;  %vm168_vm7 = vcmp.eq.s32.totalorder %v4925_v7, %v4951_v21  ;;  %v6424_v21 = vmov 0.0  }
  0x92   :  { %564 = vperm.xlu0 %4496, %v463_v15   ;;  %v220_v15 = vadd.s32 5, %v28_v5 }
  0x93   :  { %3813 = vmatprep.mubr.f32.mxu0 %v835_v25  ;;  %v836_v19 = vsub.f32 %v4948_v6, %v835_v25  ;;  %v469_v25 = vadd.s32 12, %v4828_v10  ;;  %v30_v10 = vld [vmem:[%s6240_s0 + $0x90] sm:$0xff] }
  0x94   :  { %v4955_v56 = vpop.permute.xlu0 %74  ;;  %v450_v33 = vadd.s32 12, %v30_v10 }
  0x95   :  { %4464 = vset.pattern.permute.xlu1 %v6272_v2  ;;  %v4962_v60 = vpop.permute.xlu1 %249  ;;  %v837_v59 = vand.u32 4294901760, %v836_v19  ;;  %v221_v19 = vadd.s32 5, %v4635_v20 }
  0x96   :  { %570 = vperm.xlu0 %4496, %v465_v38   ;;  %101 = vperm.xlu1 %4464, %v28_v5   ;;  %vm358_vm5 = vcmp.eq.s32.totalorder %v4925_v7, %v4962_v60  ;;  %v6423_v60 = vmov 0  }
  0x97   :  { %3546 = vmatprep.mubr.f32.mxu1 %v837_v59  ;;  %v448_v59 = vadd.s32 12, %v28_v5  ;;  %vm396_vm8 = vmor %vm168_vm7, %vm358_vm5 }
  0x98   :  { %v4965_v54 = vpop.permute.xlu0 %80  ;;  %vm395_vm5 = vmor %vm167_vm1, %vm357_vm13 }
  0x99   :  { %v4967_v53 = vpop.permute.xlu1 %252 }
  0x9a   :  { %576 = vperm.xlu0 %4496, %v467_v13   ;;  %4465 = vset.pattern.permute.xlu1 %v6261_v3  ;;  %vm359_vm7 = vcmp.eq.s32.totalorder %v4925_v7, %v4967_v53 }
  0x9b   :  { %291 = vperm.xlu1 %4465, %v220_v15   ;;  %v222_v15 = vadd.s32 5, %v30_v10 }
  0x9c   :  { %v4971_v52 = vpop.permute.xlu0 %86 }
  0x9e   :  { %582 = vperm.xlu0 %4496, %v469_v25   ;;  %v478_v38 = vpop.permute.xlu1 %477 }
  0x9f   :  { %294 = vperm.xlu1 %4465, %v221_v19   ;;  %v223_v19 = vadd.s32 5, %v4642_v22  ;;  %vm586_vm6 = vcmp.eq.s32.totalorder %v4925_v7, %v478_v38 }
  0xa0   :  { %v4974_v61 = vpop.permute.xlu0 %92  ;;  %vm5022_vm9 = vmor %vm396_vm8, %vm586_vm6  ;;  %vm169_vm6 = vcmp.eq.s32.totalorder %v4925_v7, %v4935_v9  ;;  %v6439_v9 = vmov 0 }
  0xa3   :  { %4466 = vset.pattern.permute.xlu1 %v6264_v8  ;;  %v66_v46 = vpop.permute.xlu1 %65 }
  0xa4   :  { %v4977_v45 = vpop.permute.xlu0 %98  ;;  %519 = vperm.xlu1 %4466, %v448_v59   ;;  %vm170_vm12 = vcmp.eq.s32.totalorder %v4925_v7, %v66_v46 }
  0xa8   :  { %v4982_v13 = vpop.permute.xlu0 %104  ;;  %4467 = vset.pattern.permute.xlu1 %v6272_v2  ;;  %v256_v20 = vpop.permute.xlu1 %255 }
  0xa9   :  { %107 = vperm.xlu1 %4467, %v30_v10   ;;  %vm360_vm10 = vcmp.eq.s32.totalorder %v4925_v7, %v256_v20  ;;  %v6425_v20 = vmov 0 }
  0xaa   :  { %vm398_vm14 = vmor %vm170_vm12, %vm360_vm10 }
  0xac   :  { %v4985_v25 = vpop.permute.xlu0 %110  ;;  %v4987_v5 = vpop.permute.xlu1 %258 }
  0xad   :  { %4468 = vset.pattern.permute.xlu1 %v6261_v3  ;;  %v32_v3 = vld [vmem:[%s6240_s0 + $0xa0] sm:$0xff] }
  0xae   :  { %297 = vperm.xlu1 %4468, %v222_v15   ;;  %v452_v12 = vadd.s32 12, %v32_v3 }
  0xb0   :  { %v4991_v59 = vpop.permute.xlu0 %116 }
  0xb1   :  { %v484_v40 = vpop.permute.xlu1 %483 }
  0xb2   :  { %300 = vperm.xlu1 %4468, %v223_v19   ;;  %v224_v19 = vadd.s32 5, %v32_v3  ;;  %vm588_vm11 = vcmp.eq.s32.totalorder %v4925_v7, %v484_v40 }
  0xb3   :  { %vm5040_vm15 = vmor %vm398_vm14, %vm588_vm11 }
  0xb4   :  { %v4993_v39 = vpop.permute.xlu0 %122  ;;  %v6426_v20 = vsel %vm5040_vm15, 4294967295, %v6425_v20  ;;  %v3042_v17 = vsel %vm5040_vm15, 1.0, %v6424_v21 }
  0xb5   :  { %6427 = vst [vmem:[#allocation14_spill] sm:$0xff] %v6426_v20  ;;  %v5073_v20 = vsub.f32 %v3042_v17, %v3042_v17 }
  0xb6   :  { %4469 = vset.pattern.permute.xlu1 %v6264_v8  ;;  %v72_v32 = vpop.permute.xlu1 %71  ;;  %v6418_v8 = vmov 1  }
  0xb7   :  { %525 = vperm.xlu1 %4469, %v450_v33   ;;  %v225_v33 = vadd.s32 5, %v4649_v24  ;;  %vm172_vm3 = vcmp.eq.s32.totalorder %v4925_v7, %v72_v32  ;;  %v6429_v32 = vmov 0  ;;  %6434 = vst [vmem:[#allocation17_spill] sm:$0xff] %v5073_v20 }
  0xb8   :  { %v4996_v11 = vpop.permute.xlu0 %128 }
  0xbb   :  { %4470 = vset.pattern.permute.xlu1 %v6272_v2  ;;  %v262_v22 = vpop.permute.xlu1 %261 }
  0xbc   :  { %v5002_v15 = vpop.permute.xlu0 %134  ;;  %113 = vperm.xlu1 %4470, %v32_v3   ;;  %v34_v3 = vld [vmem:[%s6240_s0 + $0xb0] sm:$0xff]  ;;  %vm362_vm0 = vcmp.eq.s32.totalorder %v4925_v7, %v262_v22 }
  0xbd   :  { %v226_v49 = vadd.s32 5, %v34_v3  ;;  %vm400_vm8 = vmor %vm172_vm3, %vm362_vm0  ;;  %v454_v53 = vadd.s32 12, %v34_v3 }
  0xbe   :  { %vm397_vm0 = vmor %vm169_vm6, %vm359_vm7  ;;  %vm171_vm6 = vcmp.eq.s32.totalorder %v4925_v7, %v4946_v48  ;;  %vm361_vm7 = vcmp.eq.s32.totalorder %v4925_v7, %v4987_v5 }
  0xbf   :  { %v5004_v6 = vpop.permute.xlu1 %264 }
  0xc0   :  { %v5006_v10 = vpop.permute.xlu0 %140  ;;  %4471 = vset.pattern.permute.xlu1 %v6418_v8 }
  0xc1   :  { %303 = vperm.xlu1 %4471, %v224_v19   ;;  %v6420_v19 = vmov 0 }
  0xc2   :  { %v6421_v19 = vsel %vm5022_vm9, 4294967295, %v6420_v19 }
  0xc3   :  { %6422 = vst [vmem:[#allocation13_spill] sm:$0xff] %v6421_v19 }
  0xc4   :  { %v5010_v23 = vpop.permute.xlu0 %146  ;;  %v490_v27 = vpop.permute.xlu1 %489 }
  0xc5   :  { %306 = vperm.xlu1 %4471, %v225_v33   ;;  %vm590_vm2 = vcmp.eq.s32.totalorder %v4925_v7, %v490_v27 }
  0xc6   :  { %vm5062_vm10 = vmor %vm400_vm8, %vm590_vm2 }
  0xc7   :  { %v6430_v32 = vsel %vm5062_vm10, 4294967295, %v6429_v32 }
  0xc8   :  { %v5012_v2 = vpop.permute.xlu0 %152  ;;  %6431 = vst [vmem:[#allocation16_spill] sm:$0xff] %v6430_v32 }
  0xc9   :  { %4472 = vset.pattern.permute.xlu1 %v6419_v62  ;;  %v78_v55 = vpop.permute.xlu1 %77 }
  0xca   :  { %531 = vperm.xlu1 %4472, %v452_v12   ;;  %v3040_v12 = vsel %vm5022_vm9, 1.0, %v6424_v21  ;;  %vm174_vm14 = vcmp.eq.s32.totalorder %v4925_v7, %v78_v55 }
  0xcb   :  { %v5047_v40 = vsub.f32 %v3040_v12, %v3040_v12 }
  0xcc   :  { %v5020_v24 = vpop.permute.xlu0 %158 }
  0xcd   :  { %6428 = vst [vmem:[#allocation15_spill] sm:$0xff] %v5047_v40  ;;  %v855_v12 = vand.u32 4294901760, %v5047_v40 }
  0xce   :  { %4473 = vset.pattern.permute.xlu1 %v6423_v60  ;;  %v268_v38 = vpop.permute.xlu1 %267 }
  0xcf   :  { %119 = vperm.xlu1 %4473, %v34_v3   ;;  %vm364_vm11 = vcmp.eq.s32.totalorder %v4925_v7, %v268_v38  ;;  %v3044_v38 = vsel %vm5062_vm10, 1.0, %v6424_v21 }
  0xd0   :  { %v5036_v33 = vpop.permute.xlu0 %164  ;;  %vm402_vm1 = vmor %vm174_vm14, %vm364_vm11  ;;  %vm173_vm11 = vcmp.eq.s32.totalorder %v4925_v7, %v4955_v56 }
  0xd2   :  { %v5050_v46 = vpop.permute.xlu1 %270 }
  0xd3   :  { %4474 = vset.pattern.permute.xlu1 %v6418_v8 }
  0xd4   :  { %309 = vperm.xlu1 %4474, %v226_v49   ;;  %v6596_v14 = vld [vmem:[#allocation15_spill] sm:$0xff] }
  0xd5   :  { %v475_v27 = vpop.permute.xlu0 %474 }
  0xd6   :  { %vm585_vm12 = vcmp.eq.s32.totalorder %v4925_v7, %v475_v27  ;;  %v6436_v27 = vmov 0 }
  0xd7   :  { %vm5068_vm13 = vmor %vm395_vm5, %vm585_vm12  ;;  %v496_v49 = vpop.permute.xlu1 %495 }
  0xd8   :  { %v3039_v26 = vsel %vm5068_vm13, 1.0, %v6424_v21  ;;  %vm592_vm2 = vcmp.eq.s32.totalorder %v4925_v7, %v496_v49  ;;  %312 = vperm.xlu1 %4474, %v227_v63   ;;  %v5106_v49 = vsub.f32 %v3044_v38, %v3044_v38  ;;  %vm399_vm12 = vmor %vm171_vm6, %vm361_vm7  ;;  %vm175_vm6 = vcmp.eq.s32.totalorder %v4925_v7, %v4965_v54 }
  0xd9   :  { %v5088_v17 = vsub.f32 %v3039_v26, %v3039_v26  ;;  %v481_v55 = vpop.permute.xlu0 %480  ;;  %vm5091_vm3 = vmor %vm402_vm1, %vm592_vm2  ;;  %v856_v26 = vsub.f32 %v5047_v40, %v855_v12  ;;  %vm365_vm7 = vcmp.eq.s32.totalorder %v4925_v7, %v5050_v46 }
  0xda   :  { %v6437_v27 = vsel %vm5091_vm3, 4294967295, %v6436_v27  ;;  %vm587_vm5 = vcmp.eq.s32.totalorder %v4925_v7, %v481_v55  ;;  %6442 = vst [vmem:[#allocation21_spill] sm:$0xff] %v5106_v49  ;;  %v875_v55 = vand.u32 4294901760, %v5073_v20  ;;  %v3046_v32 = vsel %vm5091_vm3, 1.0, %v6424_v21 }
  0xdb   :  { %6435 = vst [vmem:[#allocation18_spill] sm:$0xff] %v5088_v17  ;;  %6438 = vst [vmem:[#allocation19_spill] sm:$0xff] %v6437_v27  ;;  %v845_v63 = vand.u32 4294901760, %v5088_v17  ;;  %v857_v27 = vand.u32 4294901760, %v856_v26  ;;  %v5137_v5 = vsub.f32 %v3046_v32, %v3046_v32 }
  0xdc   :  { %vm5100_vm8 = vmor %vm397_vm0, %vm587_vm5  ;;  %4475 = vset.pattern.permute.xlu1 %v6419_v62  ;;  %v5118_v19 = vpop.permute.xlu1 %83  ;;  %vm363_vm0 = vcmp.eq.s32.totalorder %v4925_v7, %v5004_v6  ;;  %v6449_v6 = vmov 0 }
  0xdd   :  { %v6440_v9 = vsel %vm5100_vm8, 4294967295, %v6439_v9  ;;  %v3041_v3 = vsel %vm5100_vm8, 1.0, %v6424_v21  ;;  %3814 = vmatmul.mubr.f32.vlgmr.msra.gmra.mrb[0].mxu0 %v845_v63  ;;  %v487_v40 = vpop.permute.xlu0 %486  ;;  %v846_v38 = vsub.f32 %v5088_v17, %v845_v63  ;;  %537 = vperm.xlu1 %4475, %v454_v53   ;;  %6447 = vst [vmem:[#allocation24_spill] sm:$0xff] %v5137_v5  ;;  %v895_v53 = vand.u32 4294901760, %v5106_v49  ;;  %vm401_vm2 = vmor %vm173_vm11, %vm363_vm0 }
  0xde   :  { %6441 = vst [vmem:[#allocation20_spill] sm:$0xff] %v6440_v9  ;;  %v5115_v42 = vsub.f32 %v3041_v3, %v3041_v3  ;;  %vm589_vm14 = vcmp.eq.s32.totalorder %v4925_v7, %v487_v40  ;;  %3816 = vmatprep.mubr.f32.mxu0 %v855_v12  ;;  %v6444_v3 = vmov 0  ;;  %v5145_v40 = vld [vmem:[%s6240_s0 + $0xc0] sm:$0xff]  ;;  %v876_v12 = vsub.f32 %v5073_v20, %v875_v55  ;;  %vm403_vm11 = vmor %vm175_vm6, %vm365_vm7 }
  0xdf   :  { %vm5132_vm1 = vmor %vm399_vm12, %vm589_vm14  ;;  %v847_v63 = vand.u32 4294901760, %v846_v38  ;;  %v915_v20 = vand.u32 4294901760, %v5137_v5  ;;  %vm177_vm0 = vcmp.eq.s32.totalorder %v4925_v7, %v4971_v52 }
  0xe0   :  { %6443 = vst [vmem:[#allocation22_spill] sm:$0xff] %v5115_v42  ;;  %v6445_v3 = vsel %vm5132_vm1, 4294967295, %v6444_v3  ;;  %v865_v17 = vand.u32 4294901760, %v5115_v42  ;;  %v3043_v48 = vsel %vm5132_vm1, 1.0, %v6424_v21 }
  0xe1   :  { %6446 = vst [vmem:[#allocation23_spill] sm:$0xff] %v6445_v3  ;;  %v5149_v9 = vsub.f32 %v3043_v48, %v3043_v48  ;;  %3547 = vmatmul.mubr.f32.vlgmr.msra.gmra.mrb[0].mxu1 %v847_v63  ;;  %v493_v26 = vpop.permute.xlu0 %492  ;;  %4476 = vset.pattern.permute.xlu1 %v6423_v60  ;;  %v274_v38 = vpop.permute.xlu1 %273  ;;  %v228_v48 = vadd.s32 5, %v5145_v40  ;;  %v877_v63 = vand.u32 4294901760, %v876_v12 }
  0xe2   :  { %3817 = vmatmul.mubr.f32.gmra.mrb[2].mxu0 %v865_v17  ;;  %v866_v32 = vsub.f32 %v5115_v42, %v865_v17  ;;  %vm591_vm5 = vcmp.eq.s32.totalorder %v4925_v7, %v493_v26  ;;  %3549 = vmatprep.mubr.f32.mxu1 %v857_v27  ;;  %v896_v26 = vsub.f32 %v5106_v49, %v895_v53 }
  0xe3   :  { %6448 = vst [vmem:[#allocation25_spill] sm:$0xff] %v5149_v9  ;;  %vm5165_vm12 = vmor %vm401_vm2, %vm591_vm5  ;;  %3819 = vmatprep.mubr.f32.mxu0 %v875_v55  ;;  %125 = vperm.xlu1 %4476, %v5145_v40   ;;  %v885_v17 = vand.u32 4294901760, %v5149_v9 }
  0xe4   :  { %v6450_v6 = vsel %vm5165_vm12, 4294967295, %v6449_v6  ;;  %v867_v56 = vand.u32 4294901760, %v866_v32  ;;  %v3045_v27 = vsel %vm5165_vm12, 1.0, %v6424_v21  ;;  %v6452_v32 = vmov 0 }
  0xe5   :  { %v5176_v42 = vsub.f32 %v3045_v27, %v3045_v27  ;;  %v499_v3 = vpop.permute.xlu0 %498  ;;  %v886_v55 = vsub.f32 %v5149_v9, %v885_v17  ;;  %v277_v12 = vpop.permute.xlu1 %276 }
  0xe6   :  { %3550 = vmatmul.mubr.f32.gmra.mrb[2].mxu1 %v867_v56  ;;  %3820 = vmatmul.mubr.f32.gmra.mrb[4].mxu0 %v885_v17  ;;  %vm593_vm14 = vcmp.eq.s32.totalorder %v4925_v7, %v499_v3  ;;  %vm367_vm5 = vcmp.eq.s32.totalorder %v4925_v7, %v277_v12  ;;  %v229_v56 = vadd.s32 5, %v4665_v28  ;;  %v916_v17 = vsub.f32 %v5137_v5, %v915_v20 }
  0xe7   :  { %6451 = vst [vmem:[#allocation26_spill] sm:$0xff] %v5176_v42  ;;  %3552 = vmatprep.mubr.f32.mxu1 %v877_v63  ;;  %3822 = vmatprep.mubr.f32.mxu0 %v895_v53  ;;  %vm5188_vm2 = vmor %vm403_vm11, %vm593_vm14  ;;  %v887_v46 = vand.u32 4294901760, %v886_v55  ;;  %v905_v54 = vand.u32 4294901760, %v5176_v42  ;;  %v897_v53 = vand.u32 4294901760, %v896_v26  ;;  %vm176_vm14 = vcmp.eq.s32.totalorder %v4925_v7, %v5118_v19  ;;  %v6597_v22 = vld [vmem:[#allocation22_spill] sm:$0xff] }
  0xe8   :  { %v6453_v32 = vsel %vm5188_vm2, 4294967295, %v6452_v32  ;;  %4477 = vset.pattern.permute.xlu1 %v6418_v8  ;;  %v3047_v3 = vsel %vm5188_vm2, 1.0, %v6424_v21  ;;  %vm405_vm7 = vmor %vm177_vm0, %vm367_vm5  ;;  %v6455_v28 = vmov 0  ;;  %vm6457_vm2 = vcmp.eq.s32.totalorder %v4925_v7, %v274_v38 }
  0xe9   :  { %315 = vperm.xlu1 %4477, %v228_v48   ;;  %v5201_v27 = vsub.f32 %v3047_v3, %v3047_v3  ;;  %v505_v63 = vpop.permute.xlu0 %504  ;;  %v906_v55 = vsub.f32 %v5176_v42, %v905_v54  ;;  %vm404_vm3 = vmor %vm176_vm14, %vm6457_vm2  ;;  %v456_v19 = vadd.s32 12, %v5145_v40 }
  0xea   :  { %3553 = vmatmul.mubr.f32.gmra.mrb[4].mxu1 %v887_v46  ;;  %3823 = vmatmul.mubr.f32.gmra.mrb[6].mxu0 %v905_v54  ;;  %vm595_vm11 = vcmp.eq.s32.totalorder %v4925_v7, %v505_v63  ;;  %v502_v48 = vpop.permute.xlu1 %501  ;;  %v6459_v54 = vmov 0 }
  0xeb   :  { %6454 = vst [vmem:[#allocation27_spill] sm:$0xff] %v5201_v27  ;;  %3555 = vmatprep.mubr.f32.mxu1 %v897_v53  ;;  %3825 = vmatprep.mubr.f32.mxu0 %v915_v20  ;;  %vm5212_vm6 = vmor %vm405_vm7, %vm595_vm11  ;;  %v907_v26 = vand.u32 4294901760, %v906_v55  ;;  %v925_v46 = vand.u32 4294901760, %v5201_v27  ;;  %vm594_vm0 = vcmp.eq.s32.totalorder %v4925_v7, %v502_v48  ;;  %v917_v20 = vand.u32 4294901760, %v916_v17  ;;  %v38_v48 = vld [vmem:[%s6240_s0 + $0xd0] sm:$0xff] }
  0xec   :  { %v6456_v28 = vsel %vm5212_vm6, 4294967295, %v6455_v28  ;;  %v3049_v52 = vsel %vm5212_vm6, 1.0, %v6424_v21  ;;  %vm5226_vm5 = vmor %vm404_vm3, %vm594_vm0  ;;  %vm179_vm3 = vcmp.eq.s32.totalorder %v4925_v7, %v4974_v61 }
  0xed   :  { %318 = vperm.xlu1 %4477, %v229_v56   ;;  %v5224_v12 = vsub.f32 %v3049_v52, %v3049_v52  ;;  %v6460_v54 = vsel %vm5226_vm5, 4294967295, %v6459_v54  ;;  %v926_v38 = vsub.f32 %v5201_v27, %v925_v46  ;;  %v3048_v3 = vsel %vm5226_vm5, 1.0, %v6424_v21 }
  0xee   :  { %3556 = vmatmul.mubr.f32.gmra.mrb[6].mxu1 %v907_v26  ;;  %3826 = vmatmul.mubr.f32.gmra.mrb[8].mxu0 %v925_v46  ;;  %v5234_v53 = vsub.f32 %v3048_v3, %v3048_v3 }
  0xef   :  { %6458 = vst [vmem:[#allocation28_spill] sm:$0xff] %v5224_v12  ;;  %3558 = vmatprep.mubr.f32.mxu1 %v917_v20  ;;  %v927_v56 = vand.u32 4294901760, %v926_v38  ;;  %v945_v40 = vand.u32 4294901760, %v5224_v12  ;;  %v90_v17 = vpop.permute.xlu1 %89  ;;  %v230_v38 = vadd.s32 5, %v38_v48 }
  0xf0   :  { %6461 = vst [vmem:[#allocation29_spill] sm:$0xff] %v5234_v53  ;;  %v935_v63 = vand.u32 4294901760, %v5234_v53  ;;  %vm178_vm6 = vcmp.eq.s32.totalorder %v4925_v7, %v90_v17 }
  0xf1   :  { %4478 = vset.pattern.permute.xlu1 %v6419_v62  ;;  %v946_v55 = vsub.f32 %v5224_v12, %v945_v40 }
  0xf2   :  { %543 = vperm.xlu1 %4478, %v456_v19   ;;  %3559 = vmatmul.mubr.f32.gmra.mrb[8].mxu1 %v927_v56  ;;  %v936_v26 = vsub.f32 %v5234_v53, %v935_v63  ;;  %v511_v19 = vpop.permute.xlu0 %510  ;;  %v231_v56 = vadd.s32 5, %v4684_v34  ;;  %v458_v34 = vadd.s32 12, %v38_v48 }
  0xf3   :  { %3828 = vmatprep.mubr.f32.mxu0 %v935_v63  ;;  %v947_v20 = vand.u32 4294901760, %v946_v55  ;;  %vm597_vm2 = vcmp.eq.s32.totalorder %v4925_v7, %v511_v19 }
  0xf4   :  { %3829 = vmatmul.mubr.f32.gmra.mrb[10].mxu0 %v945_v40  ;;  %v280_v46 = vpop.permute.xlu1 %279  ;;  %v937_v52 = vand.u32 4294901760, %v936_v26  ;;  %v6462_v40 = vmov 0  ;;  %v6465_v26 = vmov 0 }
  0xf5   :  { %vm368_vm14 = vcmp.eq.s32.totalorder %v4925_v7, %v280_v46 }
  0xf6   :  { %4479 = vset.pattern.permute.xlu1 %v6423_v60  ;;  %3561 = vmatprep.mubr.f32.mxu1 %v937_v52  ;;  %vm406_vm5 = vmor %vm178_vm6, %vm368_vm14 }
  0xf7   :  { %131 = vperm.xlu1 %4479, %v38_v48   ;;  %3562 = vmatmul.mubr.f32.gmra.mrb[10].mxu1 %v947_v20 }
  0xf8   :  { %v283_v3 = vpop.permute.xlu1 %282 }
  0xf9   :  { %vm369_vm7 = vcmp.eq.s32.totalorder %v4925_v7, %v283_v3 }
  0xfa   :  { %vm407_vm11 = vmor %vm179_vm3, %vm369_vm7 }
  0xfb   :  { %4480 = vset.pattern.permute.xlu1 %v6418_v8  ;;  %vm5252_vm0 = vmor %vm407_vm11, %vm597_vm2 }
  0xfc   :  { %321 = vperm.xlu1 %4480, %v230_v38   ;;  %v6463_v40 = vsel %vm5252_vm0, 4294967295, %v6462_v40  ;;  %v3051_v61 = vsel %vm5252_vm0, 1.0, %v6424_v21  ;;  %v40_v38 = vld [vmem:[%s6240_s0 + $0xe0] sm:$0xff] }
  0xfd   :  { %v5260_v63 = vsub.f32 %v3051_v61, %v3051_v61  ;;  %v508_v55 = vpop.permute.xlu1 %507 }
  0xfe   :  { %vm596_vm12 = vcmp.eq.s32.totalorder %v4925_v7, %v508_v55 }
  0xff   :  { %6464 = vst [vmem:[#allocation30_spill] sm:$0xff] %v5260_v63  ;;  %vm5263_vm3 = vmor %vm406_vm5, %vm596_vm12  ;;  %v965_v52 = vand.u32 4294901760, %v5260_v63  ;;  %vm181_vm12 = vcmp.eq.s32.totalorder %v4925_v7, %v4977_v45 }
 0x100   :  { %324 = vperm.xlu1 %4480, %v231_v56   ;;  %v6466_v26 = vsel %vm5263_vm3, 4294967295, %v6465_v26  ;;  %v3050_v46 = vsel %vm5263_vm3, 1.0, %v6424_v21 }
 0x101   :  { %v5271_v20 = vsub.f32 %v3050_v46, %v3050_v46  ;;  %v966_v48 = vsub.f32 %v5260_v63, %v965_v52  ;;  %v517_v46 = vpop.permute.xlu0 %516 }
 0x102   :  { %v96_v17 = vpop.permute.xlu1 %95  ;;  %vm599_vm6 = vcmp.eq.s32.totalorder %v4925_v7, %v517_v46 }
 0x103   :  { %6467 = vst [vmem:[#allocation31_spill] sm:$0xff] %v5271_v20  ;;  %v955_v19 = vand.u32 4294901760, %v5271_v20  ;;  %v967_v55 = vand.u32 4294901760, %v966_v48  ;;  %vm180_vm14 = vcmp.eq.s32.totalorder %v4925_v7, %v96_v17 }
 0x104   :  { %4481 = vset.pattern.permute.xlu1 %v6419_v62 }
 0x105   :  { %549 = vperm.xlu1 %4481, %v458_v34   ;;  %3831 = vmatprep.mubr.f32.mxu0 %v955_v19  ;;  %v956_v3 = vsub.f32 %v5271_v20, %v955_v19  ;;  %v232_v34 = vadd.s32 5, %v40_v38  ;;  %v6468_v19 = vmov 0  ;;  %v523_v20 = vpop.permute.xlu0 %522 }
 0x106   :  { %3832 = vmatmul.mubr.f32.gmra.mrb[12].mxu0 %v965_v52  ;;  %v233_v52 = vadd.s32 5, %v4710_v41  ;;  %v460_v41 = vadd.s32 12, %v40_v38 }
 0x107   :  { %v286_v56 = vpop.permute.xlu1 %285  ;;  %v957_v61 = vand.u32 4294901760, %v956_v3  ;;  %v6471_v3 = vmov 0 }
 0x108   :  { %vm370_vm7 = vcmp.eq.s32.totalorder %v4925_v7, %v286_v56 }
 0x109   :  { %4482 = vset.pattern.permute.xlu1 %v6423_v60  ;;  %3564 = vmatprep.mubr.f32.mxu1 %v957_v61  ;;  %vm408_vm0 = vmor %vm180_vm14, %vm370_vm7  ;;  %v529_v27 = vpop.permute.xlu0 %528 }
 0x10a   :  { %137 = vperm.xlu1 %4482, %v40_v38   ;;  %3565 = vmatmul.mubr.f32.gmra.mrb[12].mxu1 %v967_v55 }
 0x10b   :  { %v289_v63 = vpop.permute.xlu1 %288 }
 0x10c   :  { %vm371_vm5 = vcmp.eq.s32.totalorder %v4925_v7, %v289_v63 }
 0x10d   :  { %vm409_vm2 = vmor %vm181_vm12, %vm371_vm5 }
 0x10e   :  { %4483 = vset.pattern.permute.xlu1 %v6418_v8  ;;  %vm5288_vm11 = vmor %vm409_vm2, %vm599_vm6 }
 0x10f   :  { %327 = vperm.xlu1 %4483, %v232_v34   ;;  %v6469_v19 = vsel %vm5288_vm11, 4294967295, %v6468_v19  ;;  %v3053_v45 = vsel %vm5288_vm11, 1.0, %v6424_v21  ;;  %v42_v34 = vld [vmem:[%s6240_s0 + $0xf0] sm:$0xff] }
 0x110   :  { %v5296_v48 = vsub.f32 %v3053_v45, %v3053_v45  ;;  %v514_v63 = vpop.permute.xlu1 %513 }
 0x111   :  { %vm598_vm3 = vcmp.eq.s32.totalorder %v4925_v7, %v514_v63 }
 0x112   :  { %6470 = vst [vmem:[#allocation32_spill] sm:$0xff] %v5296_v48  ;;  %vm5299_vm12 = vmor %vm408_vm0, %vm598_vm3  ;;  %v985_v61 = vand.u32 4294901760, %v5296_v48  ;;  %vm183_vm0 = vcmp.eq.s32.totalorder %v4925_v7, %v4982_v13  ;;  %vm601_vm3 = vcmp.eq.s32.totalorder %v4925_v7, %v523_v20 }
 0x113   :  { %330 = vperm.xlu1 %4483, %v233_v52   ;;  %v6472_v3 = vsel %vm5299_vm12, 4294967295, %v6471_v3  ;;  %v3052_v56 = vsel %vm5299_vm12, 1.0, %v6424_v21 }
 0x114   :  { %v5307_v55 = vsub.f32 %v3052_v56, %v3052_v56  ;;  %v986_v38 = vsub.f32 %v5296_v48, %v985_v61 }
 0x115   :  { %v102_v17 = vpop.permute.xlu1 %101 }
 0x116   :  { %6473 = vst [vmem:[#allocation33_spill] sm:$0xff] %v5307_v55  ;;  %v975_v46 = vand.u32 4294901760, %v5307_v55  ;;  %v987_v56 = vand.u32 4294901760, %v986_v38  ;;  %vm182_vm14 = vcmp.eq.s32.totalorder %v4925_v7, %v102_v17  ;;  %v6477_v38 = vmov 0 }
 0x117   :  { %4484 = vset.pattern.permute.xlu1 %v6419_v62 }
 0x118   :  { %555 = vperm.xlu1 %4484, %v460_v41   ;;  %3834 = vmatprep.mubr.f32.mxu0 %v975_v46  ;;  %v976_v52 = vsub.f32 %v5307_v55, %v975_v46  ;;  %v234_v41 = vadd.s32 5, %v42_v34  ;;  %v6474_v46 = vmov 0 }
 0x119   :  { %3835 = vmatmul.mubr.f32.gmra.mrb[14].mxu0 %v985_v61  ;;  %v235_v61 = vadd.s32 5, %v4738_v47  ;;  %v462_v47 = vadd.s32 12, %v42_v34 }
 0x11a   :  { %v292_v45 = vpop.permute.xlu1 %291  ;;  %v977_v63 = vand.u32 4294901760, %v976_v52 }
 0x11b   :  { %vm372_vm2 = vcmp.eq.s32.totalorder %v4925_v7, %v292_v45 }
 0x11c   :  { %4485 = vset.pattern.permute.xlu1 %v6423_v60  ;;  %3567 = vmatprep.mubr.f32.mxu1 %v977_v63  ;;  %vm410_vm11 = vmor %vm182_vm14, %vm372_vm2 }
 0x11d   :  { %143 = vperm.xlu1 %4485, %v42_v34   ;;  %3568 = vmatmul.mubr.f32.gmra.mrb[14].mxu1 %v987_v56  ;;  %v4498_v56 = vld [vmem:[%s6241_s1] sm:$0xff]  ;;  %v6480_v34 = vand.u32 4294901760, %v4671_v29 }
 0x11e   :  { %v295_v48 = vpop.permute.xlu1 %294  ;;  %v44_v29 = vld [vmem:[%s6240_s0 + $0x100] sm:$0xff] }
 0x11f   :  { %vm373_vm6 = vcmp.eq.s32.totalorder %v4925_v7, %v295_v48  ;;  %v236_v49 = vadd.s32 5, %v44_v29 }
 0x120   :  { %vm411_vm5 = vmor %vm183_vm0, %vm373_vm6 }
 0x121   :  { %4486 = vset.pattern.permute.xlu1 %v6418_v8  ;;  %vm5324_vm7 = vmor %vm411_vm5, %vm601_vm3 }
 0x122   :  { %333 = vperm.xlu1 %4486, %v234_v41   ;;  %v6475_v46 = vsel %vm5324_vm7, 4294967295, %v6474_v46  ;;  %v3055_v13 = vsel %vm5324_vm7, 1.0, %v6424_v21  ;;  %v5351_v41 = vsub.f32 %v4498_v56, %v6480_v34 }
 0x123   :  { %v5332_v20 = vsub.f32 %v3055_v13, %v3055_v13  ;;  %v520_v48 = vpop.permute.xlu1 %519  ;;  %v6481_v13 = vand.u32 4294901760, %v4676_v30 }
 0x124   :  { %vm600_vm12 = vcmp.eq.s32.totalorder %v4925_v7, %v520_v48  ;;  %v1216_v12 = vand.u32 4294901760, %v5351_v41 }
 0x125   :  { %6476 = vst [vmem:[#allocation34_spill] sm:$0xff] %v5332_v20  ;;  %vm5335_vm0 = vmor %vm410_vm11, %vm600_vm12  ;;  %v1005_v45 = vand.u32 4294901760, %v5332_v20  ;;  %vm185_vm11 = vcmp.eq.s32.totalorder %v4925_v7, %v4985_v25  ;;  %vm603_vm12 = vcmp.eq.s32.totalorder %v4925_v7, %v529_v27  ;;  %v4502_v25 = vld [vmem:[%s6240_s0 + $0x108] sm:$0xff]  ;;  %v6484_v27 = vmov 0 }
 0x126   :  { %336 = vperm.xlu1 %4486, %v235_v61   ;;  %v6478_v38 = vsel %vm5335_vm0, 4294967295, %v6477_v38  ;;  %v3054_v52 = vsel %vm5335_vm0, 1.0, %v6424_v21  ;;  %v4499_v61 = vld [vmem:[%s6241_s1 + $0x8] sm:$0xff]  ;;  %v1217_v30 = vsub.f32 %v5351_v41, %v1216_v12 }
 0x127   :  { %v5343_v63 = vsub.f32 %v3054_v52, %v3054_v52  ;;  %v5358_v48 = vsub.f32 %v4499_v61, %v6481_v13  ;;  %v1006_v55 = vsub.f32 %v5332_v20, %v1005_v45 }
 0x128   :  { %v108_v17 = vpop.permute.xlu1 %107  ;;  %v1218_v5 = vand.u32 4294901760, %v1217_v30 }
 0x129   :  { %6479 = vst [vmem:[#allocation35_spill] sm:$0xff] %v5343_v63  ;;  %v995_v52 = vand.u32 4294901760, %v5343_v63  ;;  %v1223_v53 = vand.u32 4294901760, %v5358_v48  ;;  %v1007_v20 = vand.u32 4294901760, %v1006_v55  ;;  %vm184_vm14 = vcmp.eq.s32.totalorder %v4925_v7, %v108_v17 }
 0x12a   :  { %4487 = vset.pattern.permute.xlu1 %v6419_v62 }
 0x12b   :  { %561 = vperm.xlu1 %4487, %v462_v47   ;;  %3837 = vmatprep.mubr.f32.mxu0 %v995_v52  ;;  %v996_v56 = vsub.f32 %v5343_v63, %v995_v52  ;;  %v1224_v47 = vsub.f32 %v5358_v48, %v1223_v53  ;;  %v4176_v34 = vpack.c.bf16 %v1223_v53, %v1216_v12  ;;  %v4500_v52 = vld [vmem:[%s6241_s1 + $0x10] sm:$0xff]  ;;  %v4501_v12 = vld [vmem:[%s6241_s1 + $0x18] sm:$0xff]  ;;  %v6483_v53 = vand.u32 4294901760, %v4701_v37 }
 0x12c   :  { %3838 = vmatmul.mubr.f32.gmra.mrb[16].mxu0 %v1005_v45  ;;  %v6482_v45 = vand.u32 4294901760, %v4696_v36 }
 0x12d   :  { %v298_v61 = vpop.permute.xlu1 %297  ;;  %v997_v13 = vand.u32 4294901760, %v996_v56  ;;  %v1225_v42 = vand.u32 4294901760, %v1224_v47  ;;  %4177 = vmatprep.subr.bf16.mxu0 %v4176_v34  ;;  %v5383_v55 = vsub.f32 %v4501_v12, %v6483_v53  ;;  %v464_v12 = vadd.s32 12, %v44_v29 }
 0x12e   :  { %v5376_v63 = vsub.f32 %v4500_v52, %v6482_v45  ;;  %4179 = vmatpush3.bf16.msra.mxu0 %v4176_v34  ;;  %vm374_vm5 = vcmp.eq.s32.totalorder %v4925_v7, %v298_v61  ;;  %v6487_v53 = vmov 0 }
 0x12f   :  { %4488 = vset.pattern.permute.xlu1 %v6423_v60  ;;  %3570 = vmatprep.mubr.f32.mxu1 %v997_v13  ;;  %v4080_v56 = vpack.c.bf16 %v1225_v42, %v1218_v5  ;;  %v1237_v47 = vand.u32 4294901760, %v5383_v55 }
 0x130   :  { %149 = vperm.xlu1 %4488, %v44_v29   ;;  %3571 = vmatmul.mubr.f32.gmra.mrb[16].mxu1 %v1007_v20  ;;  %v1230_v36 = vand.u32 4294901760, %v5376_v63  ;;  %v237_v20 = vadd.s32 5, %v4502_v25  ;;  %v4503_v29 = vld [vmem:[%s6241_s1 + $0x20] sm:$0xff]  ;;  %v4504_v25 = vld [vmem:[%s6241_s1 + $0x28] sm:$0xff] }
 0x131   :  { %v301_v30 = vpop.permute.xlu1 %300  ;;  %4081 = vmatprep.subr.bf16.mxu1 %v4080_v56  ;;  %v1238_v42 = vsub.f32 %v5383_v55, %v1237_v47 }
 0x132   :  { %vm375_vm3 = vcmp.eq.s32.totalorder %v4925_v7, %v301_v30  ;;  %v1231_v37 = vsub.f32 %v5376_v63, %v1230_v36  ;;  %4083 = vmatpush3.bf16.msra.mxu1 %v4080_v56  ;;  %v4180_v5 = vpack.c.bf16 %v1237_v47, %v1230_v36  ;;  %v6490_v47 = vand.u32 4294901760, %v4725_v43  ;;  %v46_v43 = vld [vmem:[%s6240_s0 + $0x110] sm:$0xff] }
 0x133   :  { %vm413_vm6 = vmor %vm185_vm11, %vm375_vm3  ;;  %v1239_v52 = vand.u32 4294901760, %v1238_v42  ;;  %v238_v9 = vadd.s32 5, %v46_v43 }
 0x134   :  { %4489 = vset.pattern.permute.xlu1 %v6418_v8  ;;  %vm5398_vm2 = vmor %vm413_vm6, %vm603_vm12  ;;  %v1232_v34 = vand.u32 4294901760, %v1231_v37  ;;  %4181 = vmatprep.subr.bf16.mxu0 %v4180_v5  ;;  %v5425_v37 = vsub.f32 %v4503_v29, %v6490_v47  ;;  %vm187_vm6 = vcmp.eq.s32.totalorder %v4925_v7, %v4991_v59  ;;  %v4507_v59 = vld [vmem:[%s6240_s0 + $0x118] sm:$0xff] }
 0x135   :  { %339 = vperm.xlu1 %4489, %v236_v49   ;;  %v6485_v27 = vsel %vm5398_vm2, 4294967295, %v6484_v27  ;;  %v3057_v13 = vsel %vm5398_vm2, 1.0, %v6424_v21  ;;  %4183 = vmatpush3.bf16.msra.mxu0 %v4180_v5  ;;  %vm412_vm11 = vmor %vm184_vm14, %vm374_vm5 }
 0x136   :  { %v5406_v49 = vsub.f32 %v3057_v13, %v3057_v13  ;;  %v526_v45 = vpop.permute.xlu1 %525  ;;  %v4084_v61 = vpack.c.bf16 %v1239_v52, %v1232_v34  ;;  %v1244_v13 = vand.u32 4294901760, %v5425_v37 }
 0x137   :  { %vm602_vm3 = vcmp.eq.s32.totalorder %v4925_v7, %v526_v45 }
 0x138   :  { %6486 = vst [vmem:[#allocation36_spill] sm:$0xff] %v5406_v49  ;;  %vm5409_vm12 = vmor %vm412_vm11, %vm602_vm3  ;;  %v1025_v17 = vand.u32 4294901760, %v5406_v49  ;;  %4085 = vmatprep.subr.bf16.mxu1 %v4084_v61 }
 0x139   :  { %342 = vperm.xlu1 %4489, %v237_v20   ;;  %v6488_v53 = vsel %vm5409_vm12, 4294967295, %v6487_v53  ;;  %v3056_v56 = vsel %vm5409_vm12, 1.0, %v6424_v21  ;;  %4087 = vmatpush3.bf16.msra.mxu1 %v4084_v61  ;;  %v6491_v20 = vand.u32 4294901760, %v4730_v44  ;;  %v1245_v44 = vsub.f32 %v5425_v37, %v1244_v13 }
 0x13a   :  { %v5417_v36 = vsub.f32 %v3056_v56, %v3056_v56  ;;  %v1026_v34 = vsub.f32 %v5406_v49, %v1025_v17 }
 0x13b   :  { %v114_v30 = vpop.permute.xlu1 %113  ;;  %v5432_v42 = vsub.f32 %v4504_v25, %v6491_v20  ;;  %v535_v25 = vpop.permute.xlu0 %534  ;;  %v1246_v20 = vand.u32 4294901760, %v1245_v44 }
 0x13c   :  { %6489 = vst [vmem:[#allocation37_spill] sm:$0xff] %v5417_v36  ;;  %v1015_v5 = vand.u32 4294901760, %v5417_v36  ;;  %v1027_v47 = vand.u32 4294901760, %v1026_v34  ;;  %v6493_v34 = vand.u32 4294901760, %v4758_v51  ;;  %vm605_vm5 = vcmp.eq.s32.totalorder %v4925_v7, %v535_v25 }
 0x13d   :  { %4490 = vset.pattern.permute.xlu1 %v6419_v62  ;;  %v1251_v52 = vand.u32 4294901760, %v5432_v42 }
 0x13e   :  { %567 = vperm.xlu1 %4490, %v464_v12   ;;  %3840 = vmatprep.mubr.f32.mxu0 %v1015_v5  ;;  %v1016_v45 = vsub.f32 %v5417_v36, %v1015_v5  ;;  %v4505_v5 = vld [vmem:[%s6241_s1 + $0x30] sm:$0xff] }
 0x13f   :  { %3841 = vmatmul.mubr.f32.gmra.mrb[18].mxu0 %v1025_v17  ;;  %v1252_v61 = vsub.f32 %v5432_v42, %v1251_v52  ;;  %v4184_v12 = vpack.c.bf16 %v1251_v52, %v1244_v13  ;;  %v6492_v17 = vand.u32 4294901760, %v4753_v50  ;;  %v4506_v13 = vld [vmem:[%s6241_s1 + $0x38] sm:$0xff] }
 0x140   :  { %v304_v56 = vpop.permute.xlu1 %303  ;;  %v1017_v29 = vand.u32 4294901760, %v1016_v45  ;;  %v5457_v52 = vsub.f32 %v4506_v13, %v6493_v34  ;;  %v466_v13 = vadd.s32 12, %v46_v43  ;;  %v6498_v34 = vmov 0 }
 0x141   :  { %v1253_v49 = vand.u32 4294901760, %v1252_v61  ;;  %4185 = vmatprep.subr.bf16.mxu0 %v4184_v12  ;;  %v5450_v36 = vsub.f32 %v4505_v5, %v6492_v17  ;;  %vm376_vm3 = vcmp.eq.s32.totalorder %v4925_v7, %v304_v56 }
 0x142   :  { %4491 = vset.pattern.permute.xlu1 %v6423_v60  ;;  %3573 = vmatprep.mubr.f32.mxu1 %v1017_v29  ;;  %v1265_v61 = vand.u32 4294901760, %v5457_v52 }
 0x143   :  { %155 = vperm.xlu1 %4491, %v46_v43   ;;  %4187 = vmatpush3.bf16.msra.mxu0 %v4184_v12  ;;  %v4088_v45 = vpack.c.bf16 %v1253_v49, %v1246_v20  ;;  %v1258_v50 = vand.u32 4294901760, %v5450_v36  ;;  %v239_v12 = vadd.s32 5, %v4507_v59  ;;  %v4508_v43 = vld [vmem:[%s6241_s1 + $0x40] sm:$0xff]  ;;  %v4509_v59 = vld [vmem:[%s6241_s1 + $0x48] sm:$0xff] }
 0x144   :  { %3574 = vmatmul.mubr.f32.gmra.mrb[18].mxu1 %v1027_v47  ;;  %v307_v44 = vpop.permute.xlu1 %306  ;;  %v1266_v49 = vsub.f32 %v5457_v52, %v1265_v61  ;;  %v6494_v47 = vmov 0 }
 0x145   :  { %vm377_vm14 = vcmp.eq.s32.totalorder %v4925_v7, %v307_v44  ;;  %4089 = vmatprep.subr.bf16.mxu1 %v4088_v45  ;;  %v1259_v51 = vsub.f32 %v5450_v36, %v1258_v50  ;;  %v4188_v29 = vpack.c.bf16 %v1265_v61, %v1258_v50  ;;  %v6501_v61 = vand.u32 4294901760, %v4785_v57  ;;  %v48_v57 = vld [vmem:[%s6240_s0 + $0x120] sm:$0xff] }
 0x146   :  { %vm415_vm11 = vmor %vm187_vm6, %vm377_vm14  ;;  %4091 = vmatpush3.bf16.msra.mxu1 %v4088_v45  ;;  %v1267_v5 = vand.u32 4294901760, %v1266_v49  ;;  %vm186_vm6 = vcmp.eq.s32.totalorder %v4925_v7, %v114_v30 }
 0x147   :  { %4492 = vset.pattern.permute.xlu1 %v6418_v8  ;;  %vm5472_vm2 = vmor %vm415_vm11, %vm605_vm5  ;;  %v1260_v25 = vand.u32 4294901760, %v1259_v51  ;;  %4189 = vmatprep.subr.bf16.mxu0 %v4188_v29  ;;  %v5499_v51 = vsub.f32 %v4508_v43, %v6501_v61  ;;  %vm189_vm11 = vcmp.eq.s32.totalorder %v4925_v7, %v4993_v39 }
 0x148   :  { %345 = vperm.xlu1 %4492, %v238_v9   ;;  %v6495_v47 = vsel %vm5472_vm2, 4294967295, %v6494_v47  ;;  %v3059_v20 = vsel %vm5472_vm2, 1.0, %v6424_v21  ;;  %4191 = vmatpush3.bf16.msra.mxu0 %v4188_v29  ;;  %vm414_vm14 = vmor %vm186_vm6, %vm376_vm3 }
 0x149   :  { %6496 = vst [vmem:[#allocation38_spill] sm:$0xff] %v6495_v47  ;;  %v5480_v9 = vsub.f32 %v3059_v20, %v3059_v20  ;;  %v532_v17 = vpop.permute.xlu1 %531  ;;  %v4092_v56 = vpack.c.bf16 %v1267_v5, %v1260_v25  ;;  %v1272_v20 = vand.u32 4294901760, %v5499_v51  ;;  %v240_v47 = vadd.s32 5, %v48_v57 }
 0x14a   :  { %vm604_vm12 = vcmp.eq.s32.totalorder %v4925_v7, %v532_v17 }
 0x14b   :  { %6497 = vst [vmem:[#allocation39_spill] sm:$0xff] %v5480_v9  ;;  %vm5483_vm5 = vmor %vm414_vm14, %vm604_vm12  ;;  %v1045_v30 = vand.u32 4294901760, %v5480_v9  ;;  %4093 = vmatprep.subr.bf16.mxu1 %v4092_v56 }
 0x14c   :  { %348 = vperm.xlu1 %4492, %v239_v12   ;;  %v6499_v34 = vsel %vm5483_vm5, 4294967295, %v6498_v34  ;;  %v3058_v45 = vsel %vm5483_vm5, 1.0, %v6424_v21  ;;  %4095 = vmatpush3.bf16.msra.mxu1 %v4092_v56  ;;  %v6502_v12 = vand.u32 4294901760, %v4790_v58  ;;  %v1273_v58 = vsub.f32 %v5499_v51, %v1272_v20 }
 0x14d   :  { %v5491_v50 = vsub.f32 %v3058_v45, %v3058_v45  ;;  %v1046_v25 = vsub.f32 %v5480_v9, %v1045_v30 }
 0x14e   :  { %v120_v44 = vpop.permute.xlu1 %119  ;;  %v5506_v49 = vsub.f32 %v4509_v59, %v6502_v12  ;;  %v541_v59 = vpop.permute.xlu0 %540  ;;  %v1274_v12 = vand.u32 4294901760, %v1273_v58 }
 0x14f   :  { %6500 = vst [vmem:[#allocation40_spill] sm:$0xff] %v5491_v50  ;;  %v1035_v29 = vand.u32 4294901760, %v5491_v50  ;;  %v1047_v61 = vand.u32 4294901760, %v1046_v25  ;;  %v6504_v25 = vand.u32 4294901760, %v4819_v4  ;;  %vm607_vm12 = vcmp.eq.s32.totalorder %v4925_v7, %v541_v59 }
 0x150   :  { %4493 = vset.pattern.permute.xlu1 %v6419_v62  ;;  %v1279_v5 = vand.u32 4294901760, %v5506_v49  ;;  %v468_v59 = vadd.s32 12, %v48_v57 }
 0x151   :  { %573 = vperm.xlu1 %4493, %v466_v13   ;;  %3843 = vmatprep.mubr.f32.mxu0 %v1035_v29  ;;  %v1036_v17 = vsub.f32 %v5491_v50, %v1035_v29  ;;  %v4510_v29 = vld [vmem:[%s6241_s1 + $0x50] sm:$0xff] }
 0x152   :  { %3844 = vmatmul.mubr.f32.gmra.mrb[20].mxu0 %v1045_v30  ;;  %v1280_v56 = vsub.f32 %v5506_v49, %v1279_v5  ;;  %v4192_v13 = vpack.c.bf16 %v1279_v5, %v1272_v20  ;;  %v6503_v30 = vand.u32 4294901760, %v4814_v1 }
 0x153   :  { %v310_v45 = vpop.permute.xlu1 %309  ;;  %v1037_v43 = vand.u32 4294901760, %v1036_v17 }
 0x154   :  { %v1281_v9 = vand.u32 4294901760, %v1280_v56  ;;  %4193 = vmatprep.subr.bf16.mxu0 %v4192_v13  ;;  %v5524_v50 = vsub.f32 %v4510_v29, %v6503_v30  ;;  %vm378_vm14 = vcmp.eq.s32.totalorder %v4925_v7, %v310_v45  ;;  %v6507_v30 = vmov 0 }
 0x155   :  { %4494 = vset.pattern.permute.xlu1 %v6423_v60  ;;  %3576 = vmatprep.mubr.f32.mxu1 %v1037_v43  ;;  %v4511_v60 = vld [vmem:[%s6241_s1 + $0x58] sm:$0xff] }
 0x156   :  { %161 = vperm.xlu1 %4494, %v48_v57   ;;  %4195 = vmatpush3.bf16.msra.mxu0 %v4192_v13  ;;  %v5531_v20 = vsub.f32 %v4511_v60, %v6504_v25  ;;  %v4096_v5 = vpack.c.bf16 %v1281_v9, %v1274_v12  ;;  %v1286_v17 = vand.u32 4294901760, %v5524_v50  ;;  %v4512_v9 = vld [vmem:[%s6240_s0 + $0x128] sm:$0xff]  ;;  %v4513_v57 = vld [vmem:[%s6241_s1 + $0x60] sm:$0xff] }
 0x157   :  { %3577 = vmatmul.mubr.f32.gmra.mrb[20].mxu1 %v1047_v61  ;;  %v313_v58 = vpop.permute.xlu1 %312  ;;  %v241_v56 = vadd.s32 5, %v4512_v9 }
 0x158   :  { %v1293_v1 = vand.u32 4294901760, %v5531_v20  ;;  %vm379_vm3 = vcmp.eq.s32.totalorder %v4925_v7, %v313_v58  ;;  %4097 = vmatprep.subr.bf16.mxu1 %v4096_v5  ;;  %v1287_v4 = vsub.f32 %v5524_v50, %v1286_v17 }
 0x159   :  { %vm417_vm6 = vmor %vm189_vm11, %vm379_vm3  ;;  %4099 = vmatpush3.bf16.msra.mxu1 %v4096_v5  ;;  %vm188_vm11 = vcmp.eq.s32.totalorder %v4925_v7, %v120_v44 }
 0x15a   :  { %4495 = vset.pattern.permute.xlu1 %v6418_v8  ;;  %v1294_v13 = vsub.f32 %v5531_v20, %v1293_v1  ;;  %v4196_v43 = vpack.c.bf16 %v1293_v1, %v1286_v17  ;;  %vm5548_vm2 = vmor %vm417_vm6, %vm607_vm12  ;;  %v6505_v8 = vmov 0  ;;  %v1288_v39 = vand.u32 4294901760, %v1287_v4  ;;  %v4514_v1 = vld [vmem:[%s6241_s1 + $0x68] sm:$0xff] }
 0x15b   :  { %351 = vperm.xlu1 %4495, %v240_v47   ;;  %v6506_v8 = vsel %vm5548_vm2, 4294967295, %v6505_v8  ;;  %v3061_v61 = vsel %vm5548_vm2, 1.0, %v6424_v21  ;;  %vm416_vm3 = vmor %vm188_vm11, %vm378_vm14  ;;  %v6509_v17 = vand.u32 4294901760, %v4844_v16  ;;  %v6510_v4 = vand.u32 4294901760, %v4849_v18 }
 0x15c   :  { %v1295_v12 = vand.u32 4294901760, %v1294_v13  ;;  %4197 = vmatprep.subr.bf16.mxu0 %v4196_v43  ;;  %v5556_v47 = vsub.f32 %v3061_v61, %v3061_v61  ;;  %v538_v29 = vpop.permute.xlu1 %537  ;;  %vm191_vm6 = vcmp.eq.s32.totalorder %v4925_v7, %v4996_v11 }
 0x15d   :  { %4199 = vmatpush3.bf16.msra.mxu0 %v4196_v43  ;;  %vm606_vm5 = vcmp.eq.s32.totalorder %v4925_v7, %v538_v29  ;;  %v5575_v58 = vsub.f32 %v4513_v57, %v6509_v17  ;;  %v5582_v9 = vsub.f32 %v4514_v1, %v6510_v4  ;;  %v6511_v29 = vand.u32 4294901760, %v4868_v31  ;;  %v4516_v57 = vld [vmem:[%s6241_s1 + $0x78] sm:$0xff]  ;;  %v547_v4 = vpop.permute.xlu0 %546 }
 0x15e   :  { %v4100_v45 = vpack.c.bf16 %v1295_v12, %v1288_v39  ;;  %vm5559_vm12 = vmor %vm416_vm3, %vm606_vm5  ;;  %v1065_v44 = vand.u32 4294901760, %v5556_v47  ;;  %v4515_v12 = vld [vmem:[%s6241_s1 + $0x70] sm:$0xff]  ;;  %vm609_vm5 = vcmp.eq.s32.totalorder %v4925_v7, %v547_v4  ;;  %s4546_s1 = smov [#allocation2]  }
 0x15f   :  { %354 = vperm.xlu1 %4495, %v241_v56   ;;  %v6508_v30 = vsel %vm5559_vm12, 4294967295, %v6507_v30  ;;  %v3060_v60 = vsel %vm5559_vm12, 1.0, %v6424_v21  ;;  %v1300_v13 = vand.u32 4294901760, %v5575_v58  ;;  %v1307_v43 = vand.u32 4294901760, %v5582_v9  ;;  %s3027_s14 = sshll.u32 %s4546_s1, 4  ;;  %s3028_s14 = int_to_ptr.vmem [resolvable:$true] %s3027_s14 }
 0x160   :  { %4101 = vmatprep.subr.bf16.mxu1 %v4100_v45  ;;  %v5567_v25 = vsub.f32 %v3060_v60, %v3060_v60  ;;  %v1066_v56 = vsub.f32 %v5556_v47, %v1065_v44  ;;  %s4517_s15 = scalar_lea.vmem %s3028_s14, 4864  ;;  %p4522_p1 = scmp.lt.s32.totalorder %s3028_s14, %s3028_s14 }
 0x161   :  { %4103 = vmatpush3.bf16.msra.mxu1 %v4100_v45  ;;  %v1301_v39 = vsub.f32 %v5575_v58, %v1300_v13  ;;  %v1308_v61 = vsub.f32 %v5582_v9, %v1307_v43  ;;  %v4200_v18 = vpack.c.bf16 %v1307_v43, %v1300_v13  ;;  %v5596_v45 = vsub.f32 %v4515_v12, %v6511_v29  ;;  %p4518_p0 = scmp.ne.s32.totalorder %s3028_s14, %s4517_s15  ;;  %p4523_p2 = scmp.lt.s32.totalorder %s4517_s15, %s4517_s15 }
 0x162   :  { %v126_v5 = vpop.permute.xlu1 %125  ;;  %v1067_v1 = vand.u32 4294901760, %v1066_v56 }
 0x163   :  { %4497 = vset.pattern.permute.xlu1 %v6419_v62  ;;  %v1055_v62 = vand.u32 4294901760, %v5567_v25  ;;  %v1309_v13 = vand.u32 4294901760, %v1308_v61  ;;  %4201 = vmatprep.subr.bf16.mxu0 %v4200_v18  ;;  %v1314_v43 = vand.u32 4294901760, %v5596_v45  ;;  %vm190_vm12 = vcmp.eq.s32.totalorder %v4925_v7, %v126_v5  ;;  %p4524_p3 = por %p4523_p2, %p4522_p1 }
 0x164   :  { %579 = vperm.xlu1 %4497, %v468_v59   ;;  %4203 = vmatpush3.bf16.msra.mxu0 %v4200_v18  ;;  %v6513_v18 = vmov 0 }
 0x165   :  { %3846 = vmatprep.mubr.f32.mxu0 %v1055_v62  ;;  %v1056_v16 = vsub.f32 %v5567_v25, %v1055_v62  ;;  %v1302_v62 = vand.u32 4294901760, %v1301_v39  ;;  %v1315_v12 = vsub.f32 %v5596_v45, %v1314_v43  ;;  %p4525_p4 = pnand %p4524_p3, %p4518_p0 }
 0x166   :  { %3847 = vmatmul.mubr.f32.gmra.mrb[22].mxu0 %v1065_v44  ;;  %v6512_v44 = vand.u32 4294901760, %v4873_v0 }
 0x167   :  { %v1057_v60 = vand.u32 4294901760, %v1056_v16  ;;  %v4104_v16 = vpack.c.bf16 %v1309_v13, %v1302_v62  ;;  %v1316_v39 = vand.u32 4294901760, %v1315_v12 }
 0x168   :  { %v316_v59 = vpop.permute.xlu1 %315  ;;  %v5603_v17 = vsub.f32 %v4516_v57, %v6512_v44 }
 0x169   :  { %3579 = vmatprep.mubr.f32.mxu1 %v1057_v60  ;;  %4105 = vmatprep.subr.bf16.mxu1 %v4104_v16  ;;  %vm380_vm3 = vcmp.eq.s32.totalorder %v4925_v7, %v316_v59  ;;  %v5627_v59 = vpack.c.bf16 %v5358_v48, %v5351_v41 }
 0x16a   :  { %v1321_v31 = vand.u32 4294901760, %v5603_v17  ;;  %3580 = vmatmul.mubr.f32.gmra.mrb[22].mxu1 %v1067_v1  ;;  %v6516_v1 = vmov 0 }
 0x16b   :  { %4107 = vmatpush3.bf16.msra.mxu1 %v4104_v16 }
 0x16c   :  { %v319_v29 = vpop.permute.xlu1 %318  ;;  %v1322_v0 = vsub.f32 %v5603_v17, %v1321_v31  ;;  %v4204_v56 = vpack.c.bf16 %v1321_v31, %v1314_v43 }
 0x16d   :  { %vm381_vm14 = vcmp.eq.s32.totalorder %v4925_v7, %v319_v29  ;;  %v553_v29 = vpop.permute.xlu0 %552 }
 0x16e   :  { %vm419_vm11 = vmor %vm191_vm6, %vm381_vm14  ;;  %v1323_v61 = vand.u32 4294901760, %v1322_v0  ;;  %4205 = vmatprep.subr.bf16.mxu0 %v4204_v56 }
 0x16f   :  { %vm5614_vm2 = vmor %vm419_vm11, %vm609_vm5  ;;  %4207 = vmatpush3.bf16.msra.mxu0 %v4204_v56  ;;  %vm193_vm11 = vcmp.eq.s32.totalorder %v4925_v7, %v5002_v15  ;;  %v6518_v56 = vmov 0  ;;  %v6521_v15 = vmov 0 }
 0x170   :  { %v6514_v18 = vsel %vm5614_vm2, 4294967295, %v6513_v18  ;;  %v3063_v60 = vsel %vm5614_vm2, 1.0, %v6424_v21  ;;  %v4108_v11 = vpack.c.bf16 %v1323_v61, %v1316_v39  ;;  %4209 = vmatprep.subr.bf16.mxu0 %v4690_v35  ;;  %vm418_vm5 = vmor %vm190_vm12, %vm380_vm3  ;;  %vm611_vm12 = vcmp.eq.s32.totalorder %v4925_v7, %v553_v29 }
 0x171   :  { %v5623_v57 = vsub.f32 %v3063_v60, %v3063_v60  ;;  %v544_v44 = vpop.permute.xlu1 %543 }
 0x172   :  { %vm608_vm6 = vcmp.eq.s32.totalorder %v4925_v7, %v544_v44  ;;  %4109 = vmatprep.subr.bf16.mxu1 %v4108_v11 }
 0x173   :  { %6515 = vst [vmem:[#allocation41_spill] sm:$0xff] %v5623_v57  ;;  %vm5630_vm14 = vmor %vm418_vm5, %vm608_vm6  ;;  %4111 = vmatpush3.bf16.msra.mxu1 %v4108_v11  ;;  %v1085_v4 = vand.u32 4294901760, %v5623_v57 }
 0x174   :  { %v6517_v1 = vsel %vm5630_vm14, 4294967295, %v6516_v1  ;;  %v3062_v5 = vsel %vm5630_vm14, 1.0, %v6424_v21  ;;  %4113 = vmatprep.subr.bf16.mxu1 %v5627_v59 }
 0x175   :  { %v5639_v62 = vsub.f32 %v3062_v5, %v3062_v5  ;;  %v1086_v13 = vsub.f32 %v5623_v57, %v1085_v4 }
 0x176   :  { %v132_v41 = vpop.permute.xlu1 %131 }
 0x177   :  { %v1075_v48 = vand.u32 4294901760, %v5639_v62  ;;  %v1087_v12 = vand.u32 4294901760, %v1086_v13  ;;  %vm192_vm14 = vcmp.eq.s32.totalorder %v4925_v7, %v132_v41 }
 0x179   :  { %3849 = vmatprep.mubr.f32.mxu0 %v1075_v48  ;;  %v1076_v43 = vsub.f32 %v5639_v62, %v1075_v48 }
 0x17a   :  { %3850 = vmatmul.mubr.f32.gmra.mrb[24].mxu0 %v1085_v4 }
 0x17b   :  { %v322_v31 = vpop.permute.xlu1 %321  ;;  %v1077_v16 = vand.u32 4294901760, %v1076_v43 }
 0x17c   :  { %vm382_vm6 = vcmp.eq.s32.totalorder %v4925_v7, %v322_v31 }
 0x17d   :  { %3582 = vmatprep.mubr.f32.mxu1 %v1077_v16  ;;  %vm420_vm7 = vmor %vm192_vm14, %vm382_vm6 }
 0x17e   :  { %3583 = vmatmul.mubr.f32.gmra.mrb[24].mxu1 %v1087_v12  ;;  %v559_v12 = vpop.permute.xlu0 %558 }
 0x17f   :  { %v325_v0 = vpop.permute.xlu1 %324 }
 0x180   :  { %vm383_vm3 = vcmp.eq.s32.totalorder %v4925_v7, %v325_v0  ;;  %v6524_v0 = vmov 0 }
 0x181   :  { %vm421_vm5 = vmor %vm193_vm11, %vm383_vm3 }
 0x182   :  { %vm5649_vm2 = vmor %vm421_vm5, %vm611_vm12 }
 0x183   :  { %v6519_v56 = vsel %vm5649_vm2, 4294967295, %v6518_v56  ;;  %v3065_v39 = vsel %vm5649_vm2, 1.0, %v6424_v21 }
 0x184   :  { %v5657_v61 = vsub.f32 %v3065_v39, %v3065_v39  ;;  %v550_v60 = vpop.permute.xlu1 %549 }
 0x185   :  { %vm610_vm0 = vcmp.eq.s32.totalorder %v4925_v7, %v550_v60 }
 0x186   :  { %6520 = vst [vmem:[#allocation42_spill] sm:$0xff] %v5657_v61  ;;  %vm5660_vm10 = vmor %vm420_vm7, %vm610_vm0  ;;  %v1105_v44 = vand.u32 4294901760, %v5657_v61  ;;  %vm613_vm7 = vcmp.eq.s32.totalorder %v4925_v7, %v559_v12  ;;  %vm195_vm0 = vcmp.eq.s32.totalorder %v4925_v7, %v5006_v10  ;;  %v6527_v10 = vmov 0 }
 0x187   :  { %v6522_v15 = vsel %vm5660_vm10, 4294967295, %v6521_v15  ;;  %v3064_v11 = vsel %vm5660_vm10, 1.0, %v6424_v21 }
 0x188   :  { %v5668_v5 = vsub.f32 %v3064_v11, %v3064_v11  ;;  %v1106_v48 = vsub.f32 %v5657_v61, %v1105_v44 }
 0x189   :  { %v138_v4 = vpop.permute.xlu1 %137 }
 0x18a   :  { %6523 = vst [vmem:[#allocation43_spill] sm:$0xff] %v5668_v5  ;;  %v1095_v41 = vand.u32 4294901760, %v5668_v5  ;;  %v1107_v16 = vand.u32 4294901760, %v1106_v48  ;;  %vm194_vm5 = vcmp.eq.s32.totalorder %v4925_v7, %v138_v4 }
 0x18c   :  { %3852 = vmatprep.mubr.f32.mxu0 %v1095_v41  ;;  %v1096_v13 = vsub.f32 %v5668_v5, %v1095_v41 }
 0x18d   :  { %3853 = vmatmul.mubr.f32.gmra.mrb[26].mxu0 %v1105_v44 }
 0x18e   :  { %v328_v43 = vpop.permute.xlu1 %327  ;;  %v1097_v31 = vand.u32 4294901760, %v1096_v13 }
 0x18f   :  { %vm384_vm11 = vcmp.eq.s32.totalorder %v4925_v7, %v328_v43 }
 0x190   :  { %3585 = vmatprep.mubr.f32.mxu1 %v1097_v31  ;;  %vm422_vm6 = vmor %vm194_vm5, %vm384_vm11 }
 0x191   :  { %3586 = vmatmul.mubr.f32.gmra.mrb[26].mxu1 %v1107_v16 }
 0x192   :  { %v331_v29 = vpop.permute.xlu1 %330 }
 0x193   :  { %vm385_vm14 = vcmp.eq.s32.totalorder %v4925_v7, %v331_v29 }
 0x194   :  { %vm423_vm12 = vmor %vm195_vm0, %vm385_vm14 }
 0x195   :  { %vm5678_vm3 = vmor %vm423_vm12, %vm613_vm7 }
 0x196   :  { %v6525_v0 = vsel %vm5678_vm3, 4294967295, %v6524_v0  ;;  %v3067_v39 = vsel %vm5678_vm3, 1.0, %v6424_v21 }
 0x197   :  { %v5686_v60 = vsub.f32 %v3067_v39, %v3067_v39  ;;  %v556_v11 = vpop.permute.xlu1 %555 }
 0x198   :  { %vm612_vm2 = vcmp.eq.s32.totalorder %v4925_v7, %v556_v11  ;;  %v565_v11 = vpop.permute.xlu0 %564 }
 0x199   :  { %6526 = vst [vmem:[#allocation44_spill] sm:$0xff] %v5686_v60  ;;  %vm5689_vm10 = vmor %vm422_vm6, %vm612_vm2  ;;  %v1125_v41 = vand.u32 4294901760, %v5686_v60  ;;  %vm197_vm2 = vcmp.eq.s32.totalorder %v4925_v7, %v5010_v23  ;;  %vm615_vm0 = vcmp.eq.s32.totalorder %v4925_v7, %v565_v11 }
 0x19a   :  { %v6528_v10 = vsel %vm5689_vm10, 4294967295, %v6527_v10  ;;  %v3066_v44 = vsel %vm5689_vm10, 1.0, %v6424_v21 }
 0x19b   :  { %v5697_v48 = vsub.f32 %v3066_v44, %v3066_v44  ;;  %v1126_v43 = vsub.f32 %v5686_v60, %v1125_v41  ;;  %v6530_v44 = vmov 0 }
 0x19c   :  { %v144_v13 = vpop.permute.xlu1 %143 }
 0x19d   :  { %6529 = vst [vmem:[#allocation45_spill] sm:$0xff] %v5697_v48  ;;  %v1115_v4 = vand.u32 4294901760, %v5697_v48  ;;  %v1127_v29 = vand.u32 4294901760, %v1126_v43  ;;  %vm196_vm5 = vcmp.eq.s32.totalorder %v4925_v7, %v144_v13  ;;  %v6533_v43 = vmov 0 }
 0x19f   :  { %3855 = vmatprep.mubr.f32.mxu0 %v1115_v4  ;;  %v1116_v31 = vsub.f32 %v5697_v48, %v1115_v4 }
 0x1a0   :  { %3856 = vmatmul.mubr.f32.gmra.mrb[28].mxu0 %v1125_v41 }
 0x1a1   :  { %v334_v16 = vpop.permute.xlu1 %333  ;;  %v1117_v12 = vand.u32 4294901760, %v1116_v31 }
 0x1a2   :  { %vm386_vm12 = vcmp.eq.s32.totalorder %v4925_v7, %v334_v16 }
 0x1a3   :  { %3588 = vmatprep.mubr.f32.mxu1 %v1117_v12  ;;  %vm424_vm6 = vmor %vm196_vm5, %vm386_vm12 }
 0x1a4   :  { %3589 = vmatmul.mubr.f32.gmra.mrb[28].mxu1 %v1127_v29 }
 0x1a5   :  { %v337_v39 = vpop.permute.xlu1 %336 }
 0x1a6   :  { %vm387_vm7 = vcmp.eq.s32.totalorder %v4925_v7, %v337_v39 }
 0x1a7   :  { %vm425_vm14 = vmor %vm197_vm2, %vm387_vm7 }
 0x1a8   :  { %vm5707_vm11 = vmor %vm425_vm14, %vm615_vm0 }
 0x1a9   :  { %v6531_v44 = vsel %vm5707_vm11, 4294967295, %v6530_v44  ;;  %v3069_v41 = vsel %vm5707_vm11, 1.0, %v6424_v21 }
 0x1aa   :  { %v5715_v4 = vsub.f32 %v3069_v41, %v3069_v41  ;;  %v562_v23 = vpop.permute.xlu1 %561 }
 0x1ab   :  { %vm614_vm3 = vcmp.eq.s32.totalorder %v4925_v7, %v562_v23 }
 0x1ac   :  { %6532 = vst [vmem:[#allocation46_spill] sm:$0xff] %v5715_v4  ;;  %vm5718_vm10 = vmor %vm424_vm6, %vm614_vm3  ;;  %v1145_v16 = vand.u32 4294901760, %v5715_v4  ;;  %vm199_vm3 = vcmp.eq.s32.totalorder %v4925_v7, %v5012_v2 }
 0x1ad   :  { %v6534_v43 = vsel %vm5718_vm10, 4294967295, %v6533_v43  ;;  %v3068_v31 = vsel %vm5718_vm10, 1.0, %v6424_v21 }
 0x1ae   :  { %v5726_v12 = vsub.f32 %v3068_v31, %v3068_v31  ;;  %v1146_v39 = vsub.f32 %v5715_v4, %v1145_v16  ;;  %v571_v31 = vpop.permute.xlu0 %570 }
 0x1af   :  { %v150_v29 = vpop.permute.xlu1 %149  ;;  %vm617_vm7 = vcmp.eq.s32.totalorder %v4925_v7, %v571_v31 }
 0x1b0   :  { %6535 = vst [vmem:[#allocation47_spill] sm:$0xff] %v5726_v12  ;;  %v1135_v13 = vand.u32 4294901760, %v5726_v12  ;;  %v1147_v60 = vand.u32 4294901760, %v1146_v39  ;;  %vm198_vm5 = vcmp.eq.s32.totalorder %v4925_v7, %v150_v29 }
 0x1b2   :  { %3858 = vmatprep.mubr.f32.mxu0 %v1135_v13  ;;  %v1136_v11 = vsub.f32 %v5726_v12, %v1135_v13  ;;  %v6536_v13 = vmov 0 }
 0x1b3   :  { %3859 = vmatmul.mubr.f32.gmra.mrb[30].mxu0 %v1145_v16 }
 0x1b4   :  { %v340_v41 = vpop.permute.xlu1 %339  ;;  %v1137_v23 = vand.u32 4294901760, %v1136_v11 }
 0x1b5   :  { %vm388_vm14 = vcmp.eq.s32.totalorder %v4925_v7, %v340_v41 }
 0x1b6   :  { %3591 = vmatprep.mubr.f32.mxu1 %v1137_v23  ;;  %vm426_vm6 = vmor %vm198_vm5, %vm388_vm14 }
 0x1b7   :  { %3592 = vmatmul.mubr.f32.gmra.mrb[30].mxu1 %v1147_v60 }
 0x1b8   :  { %v343_v48 = vpop.permute.xlu1 %342 }
 0x1b9   :  { %vm389_vm2 = vcmp.eq.s32.totalorder %v4925_v7, %v343_v48  ;;  %v6539_v48 = vmov 0 }
 0x1ba   :  { %vm427_vm0 = vmor %vm199_vm3, %vm389_vm2 }
 0x1bb   :  { %vm5736_vm12 = vmor %vm427_vm0, %vm617_vm7 }
 0x1bc   :  { %v6537_v13 = vsel %vm5736_vm12, 4294967295, %v6536_v13  ;;  %v3071_v60 = vsel %vm5736_vm12, 1.0, %v6424_v21 }
 0x1bd   :  { %v5744_v16 = vsub.f32 %v3071_v60, %v3071_v60  ;;  %v568_v2 = vpop.permute.xlu1 %567 }
 0x1be   :  { %vm616_vm11 = vcmp.eq.s32.totalorder %v4925_v7, %v568_v2 }
 0x1bf   :  { %6538 = vst [vmem:[#allocation48_spill] sm:$0xff] %v5744_v16  ;;  %vm5747_vm10 = vmor %vm426_vm6, %vm616_vm11  ;;  %v1165_v11 = vand.u32 4294901760, %v5744_v16  ;;  %vm201_vm11 = vcmp.eq.s32.totalorder %v4925_v7, %v5020_v24 }
 0x1c0   :  { %v6540_v48 = vsel %vm5747_vm10, 4294967295, %v6539_v48  ;;  %v3070_v39 = vsel %vm5747_vm10, 1.0, %v6424_v21 }
 0x1c1   :  { %v5755_v41 = vsub.f32 %v3070_v39, %v3070_v39  ;;  %v1166_v31 = vsub.f32 %v5744_v16, %v1165_v11  ;;  %v577_v39 = vpop.permute.xlu0 %576 }
 0x1c2   :  { %v156_v23 = vpop.permute.xlu1 %155  ;;  %vm619_vm2 = vcmp.eq.s32.totalorder %v4925_v7, %v577_v39 }
 0x1c3   :  { %6541 = vst [vmem:[#allocation49_spill] sm:$0xff] %v5755_v41  ;;  %v1155_v29 = vand.u32 4294901760, %v5755_v41  ;;  %v1167_v12 = vand.u32 4294901760, %v1166_v31  ;;  %vm200_vm5 = vcmp.eq.s32.totalorder %v4925_v7, %v156_v23 }
 0x1c5   :  { %3861 = vmatprep.mubr.f32.mxu0 %v1155_v29  ;;  %v1156_v60 = vsub.f32 %v5755_v41, %v1155_v29  ;;  %v6542_v29 = vmov 0  ;;  %v583_v5 = vpop.permute.xlu0 %582 }
 0x1c6   :  { %3862 = vmatmul.mubr.f32.gmra.mrb[32].mxu0 %v1165_v11 }
 0x1c7   :  { %v346_v2 = vpop.permute.xlu1 %345  ;;  %v1157_v4 = vand.u32 4294901760, %v1156_v60 }
 0x1c8   :  { %vm390_vm0 = vcmp.eq.s32.totalorder %v4925_v7, %v346_v2 }
 0x1c9   :  { %3594 = vmatprep.mubr.f32.mxu1 %v1157_v4  ;;  %vm428_vm6 = vmor %vm200_vm5, %vm390_vm0 }
 0x1ca   :  { %3595 = vmatmul.mubr.f32.gmra.mrb[32].mxu1 %v1167_v12 }
 0x1cb   :  { %v349_v61 = vpop.permute.xlu1 %348 }
 0x1cc   :  { %vm391_vm3 = vcmp.eq.s32.totalorder %v4925_v7, %v349_v61  ;;  %v6544_v61 = vmov 0 }
 0x1cd   :  { %vm429_vm7 = vmor %vm201_vm11, %vm391_vm3  ;;  %vm621_vm3 = vcmp.eq.s32.totalorder %v4925_v7, %v583_v5 }
 0x1ce   :  { %vm5765_vm14 = vmor %vm429_vm7, %vm619_vm2 }
 0x1cf   :  { %v6543_v29 = vsel %vm5765_vm14, 4294967295, %v6542_v29  ;;  %v3073_v4 = vsel %vm5765_vm14, 1.0, %v6424_v21 }
 0x1d0   :  { %v5773_v12 = vsub.f32 %v3073_v4, %v3073_v4  ;;  %v574_v24 = vpop.permute.xlu1 %573 }
 0x1d1   :  { %vm618_vm12 = vcmp.eq.s32.totalorder %v4925_v7, %v574_v24 }
 0x1d2   :  { %vm5776_vm10 = vmor %vm428_vm6, %vm618_vm12  ;;  %v1185_v31 = vand.u32 4294901760, %v5773_v12  ;;  %vm203_vm12 = vcmp.eq.s32.totalorder %v4925_v7, %v5036_v33 }
 0x1d3   :  { %v6545_v61 = vsel %vm5776_vm10, 4294967295, %v6544_v61  ;;  %v3072_v11 = vsel %vm5776_vm10, 1.0, %v6424_v21 }
 0x1d4   :  { %v5784_v60 = vsub.f32 %v3072_v11, %v3072_v11  ;;  %v1186_v39 = vsub.f32 %v5773_v12, %v1185_v31 }
 0x1d5   :  { %v162_v2 = vpop.permute.xlu1 %161 }
 0x1d6   :  { %v1175_v23 = vand.u32 4294901760, %v5784_v60  ;;  %v1187_v41 = vand.u32 4294901760, %v1186_v39  ;;  %vm202_vm5 = vcmp.eq.s32.totalorder %v4925_v7, %v162_v2 }
 0x1d8   :  { %3864 = vmatprep.mubr.f32.mxu0 %v1175_v23  ;;  %v1176_v4 = vsub.f32 %v5784_v60, %v1175_v23 }
 0x1d9   :  { %3865 = vmatmul.mubr.f32.gmra.mrb[34].mxu0 %v1185_v31 }
 0x1da   :  { %v352_v24 = vpop.permute.xlu1 %351  ;;  %v1177_v16 = vand.u32 4294901760, %v1176_v4 }
 0x1db   :  { %vm392_vm7 = vcmp.eq.s32.totalorder %v4925_v7, %v352_v24 }
 0x1dc   :  { %3597 = vmatprep.mubr.f32.mxu1 %v1177_v16  ;;  %vm430_vm6 = vmor %vm202_vm5, %vm392_vm7  ;;  %vm6565_vm7 = vnez %v6456_v28  ;;  %vm6566_vm5 = vnez %v6466_v26 }
 0x1dd   :  { %3598 = vmatmul.mubr.f32.gmra.mrb[34].mxu1 %v1187_v41 }
 0x1de   :  { %v355_v57 = vpop.permute.xlu1 %354 }
 0x1df   :  { %vm393_vm11 = vcmp.eq.s32.totalorder %v4925_v7, %v355_v57 }
 0x1e0   :  { %vm431_vm2 = vmor %vm203_vm12, %vm393_vm11  ;;  %vm6558_vm12 = vnez %v6450_v6  ;;  %v6605_v6 = vld [vmem:[#allocation27_spill] sm:$0xff] }
 0x1e1   :  { %vm5794_vm0 = vmor %vm431_vm2, %vm621_vm3  ;;  %vm6562_vm3 = vnez %v6453_v32  ;;  %vm6563_vm2 = vnez %v6460_v54 }
 0x1e2   :  { %v3075_v16 = vsel %vm5794_vm0, 1.0, %v6424_v21 }
 0x1e3   :  { %v5802_v41 = vsub.f32 %v3075_v16, %v3075_v16  ;;  %v580_v33 = vpop.permute.xlu1 %579 }
 0x1e4   :  { %vm620_vm14 = vcmp.eq.s32.totalorder %v4925_v7, %v580_v33  ;;  %v4545_v7 = vmov 1.0   ;;  %v4116_v33 = vpack.c.bf16 %v5383_v55, %v5376_v63  ;;  %v4120_v63 = vpack.c.bf16 %v5432_v42, %v5425_v37  ;;  %v6559_v42 = vld [vmem:[#allocation19_spill] sm:$0xff] }
 0x1e5   :  { %vm5805_vm10 = vmor %vm430_vm6, %vm620_vm14  ;;  %v1205_v31 = vand.u32 4294901760, %v5802_v41  ;;  %v4124_v37 = vpack.c.bf16 %v5457_v52, %v5450_v36  ;;  %vm6560_vm11 = vnez %v6559_v42  ;;  %v4128_v36 = vpack.c.bf16 %v5506_v49, %v5499_v51  ;;  %v6564_v52 = vld [vmem:[#allocation8_spill] sm:$0xff]  ;;  %v6567_v49 = vld [vmem:[#allocation9_spill] sm:$0xff] }
 0x1e6   :  { %v3074_v5 = vsel %vm5805_vm10, 1.0, %v6424_v21  ;;  %v4132_v51 = vpack.c.bf16 %v5531_v20, %v5524_v50  ;;  %v4136_v50 = vpack.c.bf16 %v5582_v9, %v5575_v58  ;;  %vm6568_vm6 = vnez %v6463_v40  ;;  %v6570_v20 = vld [vmem:[#allocation10_spill] sm:$0xff]  ;;  %v6573_v9 = vld [vmem:[#allocation11_spill] sm:$0xff]  ;;  %v6600_v21 = vld [vmem:[#allocation21_spill] sm:$0xff] }
 0x1e7   :  { %v5813_v23 = vsub.f32 %v3074_v5, %v3074_v5  ;;  %v1206_v39 = vsub.f32 %v5802_v41, %v1205_v31  ;;  %v6551_v5 = vld [vmem:[#allocation5_spill] sm:$0xff]  ;;  %v4140_v58 = vpack.c.bf16 %v5603_v17, %v5596_v45  ;;  %v6578_v45 = vld [vmem:[#allocation38_spill] sm:$0xff]  ;;  %v6594_v17 = vld [vmem:[#allocation12_spill] sm:$0xff] }
 0x1e9   :  { %v1195_v2 = vand.u32 4294901760, %v5813_v23  ;;  %v1207_v16 = vand.u32 4294901760, %v1206_v39  ;;  %v6561_v39 = vld [vmem:[#allocation7_spill] sm:$0xff] }
 0x1eb   :  { %3867 = vmatprep.mubr.f32.mxu0 %v1195_v2  ;;  %v1196_v4 = vsub.f32 %v5813_v23, %v1195_v2  ;;  %v6557_v2 = vld [vmem:[#allocation6_spill] sm:$0xff] }
 0x1ec   :  { %3868 = vmatmul.mubr.f32.gmra.mrb[36].mxu0 %v1205_v31  ;;  %v6607_v31 = vld [vmem:[#allocation29_spill] sm:$0xff] }
 0x1ed   :  { %3902 = vmatprep.mubr.msk.f32.mxu0 %vm4938_vm4, %v4545_v7  ;;  %v1197_v24 = vand.u32 4294901760, %v1196_v4  ;;  %v6595_v4 = vld [vmem:[#allocation18_spill] sm:$0xff] }
 0x1ef   :  { %3600 = vmatprep.mubr.f32.mxu1 %v1197_v24  ;;  %v6598_v24 = vld [vmem:[#allocation17_spill] sm:$0xff] }
 0x1f0   :  { %3601 = vmatmul.mubr.f32.gmra.mrb[36].mxu1 %v1207_v16  ;;  %3903 = vmatmul.mubr.msk.f32.vlgmr.msra.gmra.mrb[0].mxu0 %vm5068_vm13, %v4545_v7  ;;  %v6599_v16 = vld [vmem:[#allocation25_spill] sm:$0xff] }
 0x1f1   :  { %3635 = vmatprep.mubr.msk.f32.mxu1 %vm4938_vm4, %v4545_v7  ;;  %3905 = vmatprep.mubr.msk.f32.mxu0 %vm5022_vm9, %v4545_v7 }
 0x1f2   :  { %4211 = vmatpush3.bf16.msra.mxu0 %v4690_v35 }
 0x1f3   :  { %4213 = vmatprep.subr.bf16.mxu0 %v6551_v5 }
 0x1f4   :  { %3636 = vmatmul.mubr.msk.f32.vlgmr.msra.gmra.mrb[0].mxu1 %vm5068_vm13, %v4545_v7  ;;  %3906 = vmatmul.mubr.msk.f32.gmra.mrb[2].mxu0 %vm5100_vm8, %v4545_v7 }
 0x1f5   :  { %4115 = vmatpush3.bf16.msra.mxu1 %v5627_v59  ;;  %3638 = vmatprep.mubr.msk.f32.mxu1 %vm5022_vm9, %v4545_v7  ;;  %v6555_v59 = vld [vmem:[#allocation16_spill] sm:$0xff] }
 0x1f6   :  { %3908 = vmatprep.mubr.msk.f32.mxu0 %vm5040_vm15, %v4545_v7  ;;  %4117 = vmatprep.subr.bf16.mxu1 %v4116_v33  ;;  %vm6556_vm14 = vnez %v6555_v59 }
 0x1f7   :  { %4215 = vmatpush3.bf16.msra.mxu0 %v6551_v5  ;;  %v6603_v5 = vld [vmem:[#allocation24_spill] sm:$0xff] }
 0x1f8   :  { %3639 = vmatmul.mubr.msk.f32.gmra.mrb[2].mxu1 %vm5100_vm8, %v4545_v7  ;;  %3909 = vmatmul.mubr.msk.f32.gmra.mrb[4].mxu0 %vm5132_vm1, %v4545_v7 }
 0x1f9   :  { %3641 = vmatprep.mubr.msk.f32.mxu1 %vm5040_vm15, %v4545_v7  ;;  %3911 = vmatprep.mubr.msk.f32.mxu0 %vm6556_vm14, %v4545_v7 }
 0x1fa   :  { %4119 = vmatpush3.bf16.msra.mxu1 %v4116_v33  ;;  %4217 = vmatprep.subr.bf16.mxu0 %v6557_v2  ;;  %v6601_v33 = vld [vmem:[#allocation26_spill] sm:$0xff] }
 0x1fb   :  { %4121 = vmatprep.subr.bf16.mxu1 %v4120_v63  ;;  %4219 = vmatpush3.bf16.msra.mxu0 %v6557_v2 }
 0x1fc   :  { %3642 = vmatmul.mubr.msk.f32.gmra.mrb[4].mxu1 %vm5132_vm1, %v4545_v7  ;;  %3912 = vmatmul.mubr.msk.f32.gmra.mrb[6].mxu0 %vm6558_vm12, %v4545_v7 }
 0x1fd   :  { %3644 = vmatprep.mubr.msk.f32.mxu1 %vm6556_vm14, %v4545_v7  ;;  %3914 = vmatprep.mubr.msk.f32.mxu0 %vm6560_vm11, %v4545_v7 }
 0x1fe   :  { %4123 = vmatpush3.bf16.msra.mxu1 %v4120_v63  ;;  %4221 = vmatprep.subr.bf16.mxu0 %v6561_v39 }
 0x1ff   :  { %4125 = vmatprep.subr.bf16.mxu1 %v4124_v37  ;;  %4223 = vmatpush3.bf16.msra.mxu0 %v6561_v39 }
 0x200   :  { %3645 = vmatmul.mubr.msk.f32.gmra.mrb[6].mxu1 %vm6558_vm12, %v4545_v7  ;;  %3915 = vmatmul.mubr.msk.f32.gmra.mrb[8].mxu0 %vm6562_vm3, %v4545_v7 }
 0x201   :  { %3647 = vmatprep.mubr.msk.f32.mxu1 %vm6560_vm11, %v4545_v7  ;;  %3917 = vmatprep.mubr.msk.f32.mxu0 %vm6563_vm2, %v4545_v7 }
 0x202   :  { %4127 = vmatpush3.bf16.msra.mxu1 %v4124_v37  ;;  %4225 = vmatprep.subr.bf16.mxu0 %v6564_v52 }
 0x203   :  { %4129 = vmatprep.subr.bf16.mxu1 %v4128_v36  ;;  %4227 = vmatpush3.bf16.msra.mxu0 %v6564_v52 }
 0x204   :  { %3648 = vmatmul.mubr.msk.f32.gmra.mrb[8].mxu1 %vm6562_vm3, %v4545_v7  ;;  %3918 = vmatmul.mubr.msk.f32.gmra.mrb[10].mxu0 %vm6565_vm7, %v4545_v7  ;;  %vm6579_vm3 = vnez %v6578_v45 }
 0x205   :  { %3650 = vmatprep.mubr.msk.f32.mxu1 %vm6563_vm2, %v4545_v7  ;;  %3920 = vmatprep.mubr.msk.f32.mxu0 %vm6566_vm5, %v4545_v7  ;;  %vm6569_vm2 = vnez %v6472_v3 }
 0x206   :  { %4131 = vmatpush3.bf16.msra.mxu1 %v4128_v36  ;;  %4229 = vmatprep.subr.bf16.mxu0 %v6567_v49 }
 0x207   :  { %4133 = vmatprep.subr.bf16.mxu1 %v4132_v51  ;;  %4231 = vmatpush3.bf16.msra.mxu0 %v6567_v49 }
 0x208   :  { %3651 = vmatmul.mubr.msk.f32.gmra.mrb[10].mxu1 %vm6565_vm7, %v4545_v7  ;;  %3921 = vmatmul.mubr.msk.f32.gmra.mrb[12].mxu0 %vm6568_vm6, %v4545_v7  ;;  %vm6572_vm7 = vnez %v6478_v38 }
 0x209   :  { %3653 = vmatprep.mubr.msk.f32.mxu1 %vm6566_vm5, %v4545_v7  ;;  %3923 = vmatprep.mubr.msk.f32.mxu0 %vm6569_vm2, %v4545_v7  ;;  %vm6571_vm5 = vnez %v6469_v19 }
 0x20a   :  { %4135 = vmatpush3.bf16.msra.mxu1 %v4132_v51  ;;  %4233 = vmatprep.subr.bf16.mxu0 %v6570_v20 }
 0x20b   :  { %4137 = vmatprep.subr.bf16.mxu1 %v4136_v50  ;;  %4235 = vmatpush3.bf16.msra.mxu0 %v6570_v20 }
 0x20c   :  { %3654 = vmatmul.mubr.msk.f32.gmra.mrb[12].mxu1 %vm6568_vm6, %v4545_v7  ;;  %3924 = vmatmul.mubr.msk.f32.gmra.mrb[14].mxu0 %vm6571_vm5, %v4545_v7  ;;  %vm6574_vm6 = vnez %v6475_v46 }
 0x20d   :  { %3656 = vmatprep.mubr.msk.f32.mxu1 %vm6569_vm2, %v4545_v7  ;;  %3926 = vmatprep.mubr.msk.f32.mxu0 %vm6572_vm7, %v4545_v7  ;;  %vm6575_vm2 = vnez %v6488_v53 }
 0x20e   :  { %4139 = vmatpush3.bf16.msra.mxu1 %v4136_v50  ;;  %4237 = vmatprep.subr.bf16.mxu0 %v6573_v9 }
 0x20f   :  { %4141 = vmatprep.subr.bf16.mxu1 %v4140_v58  ;;  %4239 = vmatpush3.bf16.msra.mxu0 %v6573_v9 }
 0x210   :  { %3657 = vmatmul.mubr.msk.f32.gmra.mrb[14].mxu1 %vm6571_vm5, %v4545_v7  ;;  %3927 = vmatmul.mubr.msk.f32.gmra.mrb[16].mxu0 %vm6574_vm6, %v4545_v7  ;;  %vm6576_vm5 = vnez %v6485_v27 }
 0x211   :  { %3659 = vmatprep.mubr.msk.f32.mxu1 %vm6572_vm7, %v4545_v7  ;;  %3929 = vmatprep.mubr.msk.f32.mxu0 %vm6575_vm2, %v4545_v7  ;;  %vm6577_vm7 = vnez %v6499_v34 }
 0x212   :  { %4143 = vmatpush3.bf16.msra.mxu1 %v4140_v58 }
 0x214   :  { %3660 = vmatmul.mubr.msk.f32.gmra.mrb[16].mxu1 %vm6574_vm6, %v4545_v7  ;;  %3930 = vmatmul.mubr.msk.f32.gmra.mrb[18].mxu0 %vm6576_vm5, %v4545_v7  ;;  %vm6580_vm6 = vnez %v6508_v30 }
 0x215   :  { %3662 = vmatprep.mubr.msk.f32.mxu1 %vm6575_vm2, %v4545_v7  ;;  %3932 = vmatprep.mubr.msk.f32.mxu0 %vm6577_vm7, %v4545_v7  ;;  %vm6581_vm2 = vnez %v6506_v8 }
 0x218   :  { %3663 = vmatmul.mubr.msk.f32.gmra.mrb[18].mxu1 %vm6576_vm5, %v4545_v7  ;;  %3933 = vmatmul.mubr.msk.f32.gmra.mrb[20].mxu0 %vm6579_vm3, %v4545_v7  ;;  %vm6582_vm5 = vnez %v6517_v1 }
 0x219   :  { %3665 = vmatprep.mubr.msk.f32.mxu1 %vm6577_vm7, %v4545_v7  ;;  %3935 = vmatprep.mubr.msk.f32.mxu0 %vm6580_vm6, %v4545_v7  ;;  %vm6583_vm7 = vnez %v6514_v18 }
 0x21c   :  { %3666 = vmatmul.mubr.msk.f32.gmra.mrb[20].mxu1 %vm6579_vm3, %v4545_v7  ;;  %3936 = vmatmul.mubr.msk.f32.gmra.mrb[22].mxu0 %vm6581_vm2, %v4545_v7  ;;  %vm6584_vm3 = vnez %v6522_v15 }
 0x21d   :  { %3668 = vmatprep.mubr.msk.f32.mxu1 %vm6580_vm6, %v4545_v7  ;;  %3938 = vmatprep.mubr.msk.f32.mxu0 %vm6582_vm5, %v4545_v7  ;;  %vm6585_vm6 = vnez %v6519_v56 }
 0x220   :  { %3669 = vmatmul.mubr.msk.f32.gmra.mrb[22].mxu1 %vm6581_vm2, %v4545_v7  ;;  %3939 = vmatmul.mubr.msk.f32.gmra.mrb[24].mxu0 %vm6583_vm7, %v4545_v7  ;;  %vm6586_vm2 = vnez %v6528_v10 }
 0x221   :  { %3671 = vmatprep.mubr.msk.f32.mxu1 %vm6582_vm5, %v4545_v7  ;;  %3941 = vmatprep.mubr.msk.f32.mxu0 %vm6584_vm3, %v4545_v7  ;;  %vm6587_vm5 = vnez %v6525_v0 }
 0x224   :  { %3672 = vmatmul.mubr.msk.f32.gmra.mrb[24].mxu1 %vm6583_vm7, %v4545_v7  ;;  %3942 = vmatmul.mubr.msk.f32.gmra.mrb[26].mxu0 %vm6585_vm6, %v4545_v7  ;;  %vm6588_vm7 = vnez %v6534_v43 }
 0x225   :  { %3674 = vmatprep.mubr.msk.f32.mxu1 %vm6584_vm3, %v4545_v7  ;;  %3944 = vmatprep.mubr.msk.f32.mxu0 %vm6586_vm2, %v4545_v7  ;;  %vm6589_vm3 = vnez %v6531_v44 }
 0x228   :  { %3675 = vmatmul.mubr.msk.f32.gmra.mrb[26].mxu1 %vm6585_vm6, %v4545_v7  ;;  %3945 = vmatmul.mubr.msk.f32.gmra.mrb[28].mxu0 %vm6587_vm5, %v4545_v7  ;;  %vm6590_vm6 = vnez %v6540_v48 }
 0x229   :  { %3677 = vmatprep.mubr.msk.f32.mxu1 %vm6586_vm2, %v4545_v7  ;;  %3947 = vmatprep.mubr.msk.f32.mxu0 %vm6588_vm7, %v4545_v7  ;;  %vm6591_vm2 = vnez %v6537_v13 }
 0x22c   :  { %3678 = vmatmul.mubr.msk.f32.gmra.mrb[28].mxu1 %vm6587_vm5, %v4545_v7  ;;  %3948 = vmatmul.mubr.msk.f32.gmra.mrb[30].mxu0 %vm6589_vm3, %v4545_v7  ;;  %vm6592_vm5 = vnez %v6545_v61 }
 0x22d   :  { %3680 = vmatprep.mubr.msk.f32.mxu1 %vm6588_vm7, %v4545_v7  ;;  %3950 = vmatprep.mubr.msk.f32.mxu0 %vm6590_vm6, %v4545_v7  ;;  %vm6593_vm7 = vnez %v6543_v29 }
 0x230   :  { %3681 = vmatmul.mubr.msk.f32.gmra.mrb[30].mxu1 %vm6589_vm3, %v4545_v7  ;;  %3951 = vmatmul.mubr.msk.f32.gmra.mrb[32].mxu0 %vm6591_vm2, %v4545_v7 }
 0x231   :  { %3683 = vmatprep.mubr.msk.f32.mxu1 %vm6590_vm6, %v4545_v7  ;;  %3953 = vmatprep.mubr.msk.f32.mxu0 %vm6592_vm5, %v4545_v7 }
 0x234   :  { %3684 = vmatmul.mubr.msk.f32.gmra.mrb[32].mxu1 %vm6591_vm2, %v4545_v7  ;;  %3954 = vmatmul.mubr.msk.f32.gmra.mrb[34].mxu0 %vm6593_vm7, %v4545_v7 }
 0x235   :  { %3686 = vmatprep.mubr.msk.f32.mxu1 %vm6592_vm5, %v4545_v7  ;;  %3956 = vmatprep.mubr.msk.f32.mxu0 %vm5805_vm10, %v4545_v7 }
 0x238   :  { %3687 = vmatmul.mubr.msk.f32.gmra.mrb[34].mxu1 %vm6593_vm7, %v4545_v7  ;;  %3957 = vmatmul.mubr.msk.f32.gmra.mrb[36].mxu0 %vm5794_vm0, %v4545_v7 }
 0x239   :  { %3689 = vmatprep.mubr.msk.f32.mxu1 %vm5805_vm10, %v4545_v7  ;;  %3991 = vmatprep.mubr.msk.f32.mxu0 %vm4938_vm4, %v4545_v7  ;;  %vm6602_vm4 = vnez %v6453_v32  ;;  %v6609_v32 = vld [vmem:[#allocation28_spill] sm:$0xff] }
 0x23c   :  { %3690 = vmatmul.mubr.msk.f32.gmra.mrb[36].mxu1 %vm5794_vm0, %v4545_v7  ;;  %3992 = vmatmul.mubr.msk.f32.vlgmr.msra.gmra.mrb[0].mxu0 %vm5068_vm13, %v4545_v7  ;;  %vm6608_vm13 = vnez %v6466_v26  ;;  %v6615_v26 = vld [vmem:[#allocation33_spill] sm:$0xff] }
 0x23d   :  { %3724 = vmatprep.mubr.f32.mxu1 %v6594_v17  ;;  %3994 = vmatprep.mubr.msk.f32.mxu0 %vm5022_vm9, %v4545_v7  ;;  %vm6604_vm9 = vnez %v6460_v54  ;;  %v6611_v54 = vld [vmem:[#allocation31_spill] sm:$0xff] }
 0x240   :  { %3725 = vmatmul.mubr.f32.vlgmr.msra.gmra.mrb[0].mxu1 %v6595_v4  ;;  %3995 = vmatmul.mubr.msk.f32.gmra.mrb[2].mxu0 %vm5100_vm8, %v4545_v7  ;;  %vm6610_vm8 = vnez %v6463_v40  ;;  %v6617_v40 = vld [vmem:[#allocation32_spill] sm:$0xff] }
 0x241   :  { %3727 = vmatprep.mubr.f32.mxu1 %v6596_v14  ;;  %3997 = vmatprep.mubr.msk.f32.mxu0 %vm5040_vm15, %v4545_v7  ;;  %vm6606_vm15 = vnez %v6456_v28  ;;  %v6613_v28 = vld [vmem:[#allocation30_spill] sm:$0xff] }
 0x244   :  { %3728 = vmatmul.mubr.f32.gmra.mrb[2].mxu1 %v6597_v22  ;;  %3998 = vmatmul.mubr.msk.f32.gmra.mrb[4].mxu0 %vm5132_vm1, %v4545_v7  ;;  %vm6612_vm1 = vnez %v6472_v3  ;;  %v6619_v3 = vld [vmem:[#allocation35_spill] sm:$0xff] }
 0x245   :  { %3730 = vmatprep.mubr.f32.mxu1 %v6598_v24  ;;  %4000 = vmatprep.mubr.msk.f32.mxu0 %vm6556_vm14, %v4545_v7  ;;  %vm6614_vm14 = vnez %v6469_v19  ;;  %v6621_v19 = vld [vmem:[#allocation34_spill] sm:$0xff] }
 0x248   :  { %3731 = vmatmul.mubr.f32.gmra.mrb[4].mxu1 %v6599_v16  ;;  %4001 = vmatmul.mubr.msk.f32.gmra.mrb[6].mxu0 %vm6558_vm12, %v4545_v7  ;;  %vm6616_vm12 = vnez %v6478_v38  ;;  %v6623_v38 = vld [vmem:[#allocation37_spill] sm:$0xff] }
 0x249   :  { %3733 = vmatprep.mubr.f32.mxu1 %v6600_v21  ;;  %4003 = vmatprep.mubr.msk.f32.mxu0 %vm6560_vm11, %v4545_v7  ;;  %vm6618_vm11 = vnez %v6475_v46  ;;  %v6625_v46 = vld [vmem:[#allocation36_spill] sm:$0xff] }
 0x24c   :  { %3734 = vmatmul.mubr.f32.gmra.mrb[6].mxu1 %v6601_v33  ;;  %4004 = vmatmul.mubr.msk.f32.gmra.mrb[8].mxu0 %vm6602_vm4, %v4545_v7  ;;  %vm6620_vm4 = vnez %v6488_v53  ;;  %v6627_v53 = vld [vmem:[#allocation40_spill] sm:$0xff] }
 0x24d   :  { %3736 = vmatprep.mubr.f32.mxu1 %v6603_v5  ;;  %4006 = vmatprep.mubr.msk.f32.mxu0 %vm6604_vm9, %v4545_v7  ;;  %vm6622_vm9 = vnez %v6485_v27  ;;  %v6629_v27 = vld [vmem:[#allocation39_spill] sm:$0xff] }
 0x250   :  { %3737 = vmatmul.mubr.f32.gmra.mrb[8].mxu1 %v6605_v6  ;;  %4007 = vmatmul.mubr.msk.f32.gmra.mrb[10].mxu0 %vm6606_vm15, %v4545_v7  ;;  %vm6624_vm15 = vnez %v6499_v34  ;;  %v6634_v34 = vld [vmem:[#allocation41_spill] sm:$0xff] }
 0x251   :  { %3739 = vmatprep.mubr.f32.mxu1 %v6607_v31  ;;  %4009 = vmatprep.mubr.msk.f32.mxu0 %vm6608_vm13, %v4545_v7  ;;  %vm6626_vm13 = vnez %v6578_v45 }
 0x254   :  { %3740 = vmatmul.mubr.f32.gmra.mrb[10].mxu1 %v6609_v32  ;;  %4010 = vmatmul.mubr.msk.f32.gmra.mrb[12].mxu0 %vm6610_vm8, %v4545_v7  ;;  %vm6628_vm8 = vnez %v6508_v30  ;;  %v6640_v30 = vld [vmem:[#allocation45_spill] sm:$0xff] }
 0x255   :  { %3742 = vmatprep.mubr.f32.mxu1 %v6611_v54  ;;  %4012 = vmatprep.mubr.msk.f32.mxu0 %vm6612_vm1, %v4545_v7  ;;  %vm6630_vm1 = vnez %v6506_v8  ;;  %v6636_v8 = vld [vmem:[#allocation43_spill] sm:$0xff] }
 0x258   :  { %3743 = vmatmul.mubr.f32.gmra.mrb[12].mxu1 %v6613_v28  ;;  %4013 = vmatmul.mubr.msk.f32.gmra.mrb[14].mxu0 %vm6614_vm14, %v4545_v7  ;;  %vm6631_vm14 = vnez %v6517_v1  ;;  %v6644_v1 = vld [vmem:[#allocation46_spill] sm:$0xff] }
 0x259   :  { %3745 = vmatprep.mubr.f32.mxu1 %v6615_v26  ;;  %4015 = vmatprep.mubr.msk.f32.mxu0 %vm6616_vm12, %v4545_v7  ;;  %vm6632_vm12 = vnez %v6514_v18  ;;  %v6643_v18 = vld [vmem:[#allocation47_spill] sm:$0xff] }
 0x25c   :  { %3746 = vmatmul.mubr.f32.gmra.mrb[14].mxu1 %v6617_v40  ;;  %4016 = vmatmul.mubr.msk.f32.gmra.mrb[16].mxu0 %vm6618_vm11, %v4545_v7  ;;  %vm6633_vm11 = vnez %v6522_v15 }
 0x25d   :  { %3748 = vmatprep.mubr.f32.mxu1 %v6619_v3  ;;  %4018 = vmatprep.mubr.msk.f32.mxu0 %vm6620_vm4, %v4545_v7  ;;  %vm6635_vm4 = vnez %v6519_v56  ;;  %v6646_v56 = vld [vmem:[#allocation48_spill] sm:$0xff] }
 0x260   :  { %3749 = vmatmul.mubr.f32.gmra.mrb[16].mxu1 %v6621_v19  ;;  %4019 = vmatmul.mubr.msk.f32.gmra.mrb[18].mxu0 %vm6622_vm9, %v4545_v7  ;;  %vm6637_vm9 = vnez %v6528_v10 }
 0x261   :  { %3751 = vmatprep.mubr.f32.mxu1 %v6623_v38  ;;  %4021 = vmatprep.mubr.msk.f32.mxu0 %vm6624_vm15, %v4545_v7  ;;  %vm6639_vm15 = vnez %v6525_v0 }
 0x264   :  { %3752 = vmatmul.mubr.f32.gmra.mrb[18].mxu1 %v6625_v46  ;;  %4022 = vmatmul.mubr.msk.f32.gmra.mrb[20].mxu0 %vm6626_vm13, %v4545_v7  ;;  %vm6641_vm13 = vnez %v6534_v43 }
 0x265   :  { %3754 = vmatprep.mubr.f32.mxu1 %v6627_v53  ;;  %4024 = vmatprep.mubr.msk.f32.mxu0 %vm6628_vm8, %v4545_v7 }
 0x268   :  { %3755 = vmatmul.mubr.f32.gmra.mrb[20].mxu1 %v6629_v27  ;;  %4025 = vmatmul.mubr.msk.f32.gmra.mrb[22].mxu0 %vm6630_vm1, %v4545_v7 }
 0x269   :  { %3757 = vmatprep.mubr.f32.mxu1 %v5567_v25  ;;  %4027 = vmatprep.mubr.msk.f32.mxu0 %vm6631_vm14, %v4545_v7  ;;  %v6642_v25 = vld [vmem:[#allocation44_spill] sm:$0xff] }
 0x26c   :  { %3758 = vmatmul.mubr.f32.gmra.mrb[22].mxu1 %v5556_v47  ;;  %4028 = vmatmul.mubr.msk.f32.gmra.mrb[24].mxu0 %vm6632_vm12, %v4545_v7  ;;  %v6638_v47 = vld [vmem:[#allocation42_spill] sm:$0xff] }
 0x26d   :  { %3760 = vmatprep.mubr.f32.mxu1 %v5639_v62  ;;  %4030 = vmatprep.mubr.msk.f32.mxu0 %vm6633_vm11, %v4545_v7  ;;  %v6645_v62 = vld [vmem:[#allocation49_spill] sm:$0xff] }
 0x270   :  { %3761 = vmatmul.mubr.f32.gmra.mrb[24].mxu1 %v6634_v34  ;;  %4031 = vmatmul.mubr.msk.f32.gmra.mrb[26].mxu0 %vm6635_vm4, %v4545_v7 }
 0x271   :  { %3763 = vmatprep.mubr.f32.mxu1 %v6636_v8  ;;  %4033 = vmatprep.mubr.msk.f32.mxu0 %vm6637_vm9, %v4545_v7 }
 0x274   :  { %3764 = vmatmul.mubr.f32.gmra.mrb[26].mxu1 %v6638_v47  ;;  %4034 = vmatmul.mubr.msk.f32.gmra.mrb[28].mxu0 %vm6639_vm15, %v4545_v7 }
 0x275   :  { %3766 = vmatprep.mubr.f32.mxu1 %v6640_v30  ;;  %4036 = vmatprep.mubr.msk.f32.mxu0 %vm6641_vm13, %v4545_v7 }
 0x278   :  { %3767 = vmatmul.mubr.f32.gmra.mrb[28].mxu1 %v6642_v25  ;;  %4037 = vmatmul.mubr.msk.f32.gmra.mrb[30].mxu0 %vm6589_vm3, %v4545_v7 }
 0x279   :  { %3769 = vmatprep.mubr.f32.mxu1 %v6643_v18  ;;  %4039 = vmatprep.mubr.msk.f32.mxu0 %vm6590_vm6, %v4545_v7 }
 0x27c   :  { %3770 = vmatmul.mubr.f32.gmra.mrb[30].mxu1 %v6644_v1  ;;  %4040 = vmatmul.mubr.msk.f32.gmra.mrb[32].mxu0 %vm6591_vm2, %v4545_v7 }
 0x27d   :  { %3772 = vmatprep.mubr.f32.mxu1 %v6645_v62  ;;  %4042 = vmatprep.mubr.msk.f32.mxu0 %vm6592_vm5, %v4545_v7 }
 0x280   :  { %3773 = vmatmul.mubr.f32.gmra.mrb[32].mxu1 %v6646_v56  ;;  %4043 = vmatmul.mubr.msk.f32.gmra.mrb[34].mxu0 %vm6593_vm7, %v4545_v7 }
 0x281   :  { %3775 = vmatprep.mubr.f32.mxu1 %v5784_v60  ;;  %4045 = vmatprep.mubr.msk.f32.mxu0 %vm5805_vm10, %v4545_v7 }
 0x284   :  { %3776 = vmatmul.mubr.f32.gmra.mrb[34].mxu1 %v5773_v12  ;;  %4046 = vmatmul.mubr.msk.f32.gmra.mrb[36].mxu0 %vm5794_vm0, %v4545_v7 }
 0x285   :  { %3778 = vmatprep.mubr.f32.mxu1 %v5813_v23 }
 0x288   :  { %3779 = vmatmul.mubr.f32.gmra.mrb[36].mxu1 %v5802_v41 }
 0x30f   :  { %v3993_v15 = vpop.f32.mrb[0].mxu0 }
 0x310   :  { %v2758_v0 = vpop.f32.mrb[1].mxu0 }
 0x313   :  { %v3726_v10 = vpop.f32.mrb[0].mxu1  ;;  %v3996_v44 = vpop.f32.mrb[2].mxu0 }
 0x314   :  { %v4240_v43 = vadd.f32 %v3993_v15, %v3726_v10  ;;  %v1686_v13 = vpop.f32.mrb[1].mxu1  ;;  %v2770_v48 = vpop.f32.mrb[3].mxu0 }
 0x315   :  { %v4241_v29 = vadd.f32 %v2758_v0, %v1686_v13 }
 0x316   :  { %2985 = vst [vmem:[#allocation2 + $0x8] sm:$0xff] %v4240_v43 }
 0x317   :  { %2984 = vst [vmem:[#allocation2] sm:$0xff] %v4241_v29  ;;  %v3729_v61 = vpop.f32.mrb[2].mxu1  ;;  %v3999_v12 = vpop.f32.mrb[4].mxu0 }
 0x318   :  { %v4242_v60 = vadd.f32 %v3996_v44, %v3729_v61  ;;  %v1700_v57 = vpop.f32.mrb[3].mxu1  ;;  %v2782_v11 = vpop.f32.mrb[5].mxu0 }
 0x319   :  { %v4243_v7 = vadd.f32 %v2770_v48, %v1700_v57 }
 0x31a   :  { %2987 = vst [vmem:[#allocation2 + $0x18] sm:$0xff] %v4242_v60 }
 0x31b   :  { %2986 = vst [vmem:[#allocation2 + $0x10] sm:$0xff] %v4243_v7  ;;  %v3732_v23 = vpop.f32.mrb[4].mxu1  ;;  %v4002_v41 = vpop.f32.mrb[6].mxu0 }
 0x31c   :  { %v4244_v35 = vadd.f32 %v3999_v12, %v3732_v23  ;;  %v1714_v63 = vpop.f32.mrb[5].mxu1  ;;  %v2794_v55 = vpop.f32.mrb[7].mxu0 }
 0x31d   :  { %v4245_v59 = vadd.f32 %v2782_v11, %v1714_v63 }
 0x31e   :  { %2989 = vst [vmem:[#allocation2 + $0x28] sm:$0xff] %v4244_v35 }
 0x31f   :  { %2988 = vst [vmem:[#allocation2 + $0x20] sm:$0xff] %v4245_v59  ;;  %v3735_v2 = vpop.f32.mrb[6].mxu1  ;;  %v4005_v37 = vpop.f32.mrb[8].mxu0 }
 0x320   :  { %v4246_v42 = vadd.f32 %v4002_v41, %v3735_v2  ;;  %v1728_v39 = vpop.f32.mrb[7].mxu1  ;;  %v2806_v36 = vpop.f32.mrb[9].mxu0 }
 0x321   :  { %v4247_v52 = vadd.f32 %v2794_v55, %v1728_v39 }
 0x322   :  { %2991 = vst [vmem:[#allocation2 + $0x38] sm:$0xff] %v4246_v42 }
 0x323   :  { %2990 = vst [vmem:[#allocation2 + $0x30] sm:$0xff] %v4247_v52  ;;  %v3738_v51 = vpop.f32.mrb[8].mxu1  ;;  %v4008_v49 = vpop.f32.mrb[10].mxu0 }
 0x324   :  { %v4248_v50 = vadd.f32 %v4005_v37, %v3738_v51  ;;  %v1742_v20 = vpop.f32.mrb[9].mxu1  ;;  %v2818_v58 = vpop.f32.mrb[11].mxu0 }
 0x325   :  { %v4249_v9 = vadd.f32 %v2806_v36, %v1742_v20 }
 0x326   :  { %2993 = vst [vmem:[#allocation2 + $0x48] sm:$0xff] %v4248_v50 }
 0x327   :  { %2992 = vst [vmem:[#allocation2 + $0x40] sm:$0xff] %v4249_v9  ;;  %v3741_v45 = vpop.f32.mrb[10].mxu1  ;;  %v4011_v17 = vpop.f32.mrb[12].mxu0 }
 0x328   :  { %v4250_v4 = vadd.f32 %v4008_v49, %v3741_v45  ;;  %v1756_v14 = vpop.f32.mrb[11].mxu1  ;;  %v2830_v22 = vpop.f32.mrb[13].mxu0 }
 0x329   :  { %v4251_v24 = vadd.f32 %v2818_v58, %v1756_v14 }
 0x32a   :  { %2995 = vst [vmem:[#allocation2 + $0x58] sm:$0xff] %v4250_v4 }
 0x32b   :  { %2994 = vst [vmem:[#allocation2 + $0x50] sm:$0xff] %v4251_v24  ;;  %v3744_v16 = vpop.f32.mrb[12].mxu1  ;;  %v4014_v21 = vpop.f32.mrb[14].mxu0 }
 0x32c   :  { %v4252_v33 = vadd.f32 %v4011_v17, %v3744_v16  ;;  %v1770_v5 = vpop.f32.mrb[13].mxu1  ;;  %v2842_v6 = vpop.f32.mrb[15].mxu0 }
 0x32d   :  { %v4253_v31 = vadd.f32 %v2830_v22, %v1770_v5 }
 0x32e   :  { %2997 = vst [vmem:[#allocation2 + $0x68] sm:$0xff] %v4252_v33 }
 0x32f   :  { %2996 = vst [vmem:[#allocation2 + $0x60] sm:$0xff] %v4253_v31  ;;  %v3747_v32 = vpop.f32.mrb[14].mxu1  ;;  %v4017_v54 = vpop.f32.mrb[16].mxu0 }
 0x330   :  { %v4254_v28 = vadd.f32 %v4014_v21, %v3747_v32  ;;  %v1784_v26 = vpop.f32.mrb[15].mxu1  ;;  %v2854_v40 = vpop.f32.mrb[17].mxu0 }
 0x331   :  { %v4255_v3 = vadd.f32 %v2842_v6, %v1784_v26 }
 0x332   :  { %2999 = vst [vmem:[#allocation2 + $0x78] sm:$0xff] %v4254_v28 }
 0x333   :  { %2998 = vst [vmem:[#allocation2 + $0x70] sm:$0xff] %v4255_v3  ;;  %v3750_v19 = vpop.f32.mrb[16].mxu1  ;;  %v4020_v38 = vpop.f32.mrb[18].mxu0 }
 0x334   :  { %v4256_v46 = vadd.f32 %v4017_v54, %v3750_v19  ;;  %v1798_v53 = vpop.f32.mrb[17].mxu1  ;;  %v2866_v27 = vpop.f32.mrb[19].mxu0 }
 0x335   :  { %v4257_v34 = vadd.f32 %v2854_v40, %v1798_v53 }
 0x336   :  { %3001 = vst [vmem:[#allocation2 + $0x88] sm:$0xff] %v4256_v46 }
 0x337   :  { %3000 = vst [vmem:[#allocation2 + $0x80] sm:$0xff] %v4257_v34  ;;  %v3753_v8 = vpop.f32.mrb[18].mxu1  ;;  %v4023_v47 = vpop.f32.mrb[20].mxu0 }
 0x338   :  { %v4258_v30 = vadd.f32 %v4020_v38, %v3753_v8  ;;  %v1812_v25 = vpop.f32.mrb[19].mxu1  ;;  %v2878_v18 = vpop.f32.mrb[21].mxu0 }
 0x339   :  { %v4259_v1 = vadd.f32 %v2866_v27, %v1812_v25 }
 0x33a   :  { %3003 = vst [vmem:[#allocation2 + $0x98] sm:$0xff] %v4258_v30 }
 0x33b   :  { %3002 = vst [vmem:[#allocation2 + $0x90] sm:$0xff] %v4259_v1  ;;  %v3756_v62 = vpop.f32.mrb[20].mxu1  ;;  %v4026_v56 = vpop.f32.mrb[22].mxu0 }
 0x33c   :  { %v4260_v15 = vadd.f32 %v4023_v47, %v3756_v62  ;;  %v1826_v0 = vpop.f32.mrb[21].mxu1  ;;  %v2890_v10 = vpop.f32.mrb[23].mxu0 }
 0x33d   :  { %v4261_v44 = vadd.f32 %v2878_v18, %v1826_v0 }
 0x33e   :  { %3005 = vst [vmem:[#allocation2 + $0xa8] sm:$0xff] %v4260_v15 }
 0x33f   :  { %3004 = vst [vmem:[#allocation2 + $0xa0] sm:$0xff] %v4261_v44  ;;  %v3759_v43 = vpop.f32.mrb[22].mxu1  ;;  %v4029_v13 = vpop.f32.mrb[24].mxu0 }
 0x340   :  { %v4262_v48 = vadd.f32 %v4026_v56, %v3759_v43  ;;  %v1840_v29 = vpop.f32.mrb[23].mxu1  ;;  %v2902_v61 = vpop.f32.mrb[25].mxu0 }
 0x341   :  { %v4263_v12 = vadd.f32 %v2890_v10, %v1840_v29 }
 0x342   :  { %3007 = vst [vmem:[#allocation2 + $0xb8] sm:$0xff] %v4262_v48 }
 0x343   :  { %3006 = vst [vmem:[#allocation2 + $0xb0] sm:$0xff] %v4263_v12  ;;  %v3762_v60 = vpop.f32.mrb[24].mxu1  ;;  %v4032_v57 = vpop.f32.mrb[26].mxu0 }
 0x344   :  { %v4264_v11 = vadd.f32 %v4029_v13, %v3762_v60  ;;  %v1854_v7 = vpop.f32.mrb[25].mxu1  ;;  %v2914_v23 = vpop.f32.mrb[27].mxu0 }
 0x345   :  { %v4265_v41 = vadd.f32 %v2902_v61, %v1854_v7 }
 0x346   :  { %3009 = vst [vmem:[#allocation2 + $0xc8] sm:$0xff] %v4264_v11 }
 0x347   :  { %3008 = vst [vmem:[#allocation2 + $0xc0] sm:$0xff] %v4265_v41  ;;  %v3765_v35 = vpop.f32.mrb[26].mxu1  ;;  %v4035_v63 = vpop.f32.mrb[28].mxu0 }
 0x348   :  { %v4266_v55 = vadd.f32 %v4032_v57, %v3765_v35  ;;  %v1868_v59 = vpop.f32.mrb[27].mxu1  ;;  %v2926_v2 = vpop.f32.mrb[29].mxu0 }
 0x349   :  { %v4267_v37 = vadd.f32 %v2914_v23, %v1868_v59 }
 0x34a   :  { %3011 = vst [vmem:[#allocation2 + $0xd8] sm:$0xff] %v4266_v55 }
 0x34b   :  { %3010 = vst [vmem:[#allocation2 + $0xd0] sm:$0xff] %v4267_v37  ;;  %v3768_v42 = vpop.f32.mrb[28].mxu1  ;;  %v4038_v39 = vpop.f32.mrb[30].mxu0 }
 0x34c   :  { %v4268_v36 = vadd.f32 %v4035_v63, %v3768_v42  ;;  %v1882_v52 = vpop.f32.mrb[29].mxu1  ;;  %v2938_v51 = vpop.f32.mrb[31].mxu0 }
 0x34d   :  { %v4269_v49 = vadd.f32 %v2926_v2, %v1882_v52 }
 0x34e   :  { %3013 = vst [vmem:[#allocation2 + $0xe8] sm:$0xff] %v4268_v36 }
 0x34f   :  { %3012 = vst [vmem:[#allocation2 + $0xe0] sm:$0xff] %v4269_v49  ;;  %v3771_v50 = vpop.f32.mrb[30].mxu1  ;;  %v4041_v20 = vpop.f32.mrb[32].mxu0 }
 0x350   :  { %v4270_v58 = vadd.f32 %v4038_v39, %v3771_v50  ;;  %v1896_v9 = vpop.f32.mrb[31].mxu1  ;;  %v2950_v45 = vpop.f32.mrb[33].mxu0 }
 0x351   :  { %v4271_v17 = vadd.f32 %v2938_v51, %v1896_v9 }
 0x352   :  { %3015 = vst [vmem:[#allocation2 + $0xf8] sm:$0xff] %v4270_v58 }
 0x353   :  { %3014 = vst [vmem:[#allocation2 + $0xf0] sm:$0xff] %v4271_v17  ;;  %v3774_v4 = vpop.f32.mrb[32].mxu1  ;;  %v4044_v14 = vpop.f32.mrb[34].mxu0 }
 0x354   :  { %v4272_v22 = vadd.f32 %v4041_v20, %v3774_v4  ;;  %v1910_v24 = vpop.f32.mrb[33].mxu1  ;;  %v2962_v16 = vpop.f32.mrb[35].mxu0 }
 0x355   :  { %v4273_v21 = vadd.f32 %v2950_v45, %v1910_v24 }
 0x356   :  { %3017 = vst [vmem:[#allocation2 + $0x108] sm:$0xff] %v4272_v22 }
 0x357   :  { %3016 = vst [vmem:[#allocation2 + $0x100] sm:$0xff] %v4273_v21  ;;  %v3777_v33 = vpop.f32.mrb[34].mxu1  ;;  %v4047_v5 = vpop.f32.mrb[36].mxu0 }
 0x358   :  { %v4274_v6 = vadd.f32 %v4044_v14, %v3777_v33  ;;  %v1924_v31 = vpop.f32.mrb[35].mxu1  ;;  %v2974_v32 = vpop.f32.mrb[37].mxu0 }
 0x359   :  { %v4275_v54 = vadd.f32 %v2962_v16, %v1924_v31 }
 0x35a   :  { %3019 = vst [vmem:[#allocation2 + $0x118] sm:$0xff] %v4274_v6 }
 0x35b   :  { %3018 = vst [vmem:[#allocation2 + $0x110] sm:$0xff] %v4275_v54  ;;  %v3780_v28 = vpop.f32.mrb[36].mxu1 }
 0x35c   :  { %v4276_v26 = vadd.f32 %v4047_v5, %v3780_v28  ;;  %v1938_v40 = vpop.f32.mrb[37].mxu1 }
 0x35d   :  { %v4277_v3 = vadd.f32 %v2974_v32, %v1938_v40 }
 0x35e   :  { %3021 = vst [vmem:[#allocation2 + $0x128] sm:$0xff] %v4276_v26 }
 0x35f   :  { %3020 = vst [vmem:[#allocation2 + $0x120] sm:$0xff] %v4277_v3 }
 0x360   :  { %4528 = shalt.err (!%p4525_p4)
}
 0x361   :  { %s4529_s18 = scalar_lea.hbm %s6242_s2, 4864 }
 0x362   :  { %p4530_p5 = scmp.ne.s32.totalorder %s6242_s2, %s4529_s18  ;;  %p4533_p6 = scmp.lt.u32.totalorder %s4529_s18, %s6242_s2 }
 0x364   :  { %p4535_p7 = pnand %p4533_p6, %p4530_p5 }
 0x366   :  { %4538 = shalt.err (!%p4535_p7)
}
 0x367   :  { %s4547_s23 = smov 128   ;;  %s4548_s24 = smov 8  }
 0x368   :  { %3033 = dma.vmem_to_hbm [thread:$0]  %s3028_s14, 4864, %s6242_s2, [#allocation3], %s4547_s23, %s4547_s23, %s4548_s24  }
 0x369   :  { %4539 = dma.done.wait [#allocation3], 4864  }
 0x36a   :  { %4540 = vsyncadd [#allocation3], 4294962432 }
 0x36b   :  { %3037 = vsyncpa [#allocation3], 1 }

</bundles_post_ra>
